<compile_context>
chip_gen: v7x
topology: tpu7x:2x2x1
jax: 0.10.0
libtpu: 0.0.40
codegen_flags: <defaults>
</compile_context>

<pallas_src>
import math
import jax
import jax.numpy as jnp
from jax.experimental import pallas as pl
from jax.experimental.pallas import tpu as pltpu

# ---------------- synthetic "config" (small shapes) ----------------
VOCAB = 64
MAX_POS = 16
TYPE_VOCAB = 2
HIDDEN = 32
N_HEADS = 4
HEAD_DIM = HIDDEN // N_HEADS
INTERMEDIATE = 64
N_LAYERS = 2
NUM_CLASSES = 3
LN_EPS = 1e-12

BATCH = 2
SEQ = 8
BS = BATCH * SEQ


# ---------------- in-kernel helpers (operate on values) ----------------
def _layernorm(x, g, b):
    mu = jnp.mean(x, axis=-1, keepdims=True)
    var = jnp.mean((x - mu) ** 2, axis=-1, keepdims=True)
    return (x - mu) * jax.lax.rsqrt(var + LN_EPS) * g + b


# ---------------- the fused encoder + pooler + classifier kernel ----------------
def encoder_kernel(x_ref, mask_ref, emb_g_ref, emb_b_ref,
                   qkv_w_ref, qkv_b_ref, o_w_ref, o_b_ref,
                   ln1_g_ref, ln1_b_ref, i_w_ref, i_b_ref,
                   f_w_ref, f_b_ref, ln2_g_ref, ln2_b_ref,
                   pool_w_ref, pool_b_ref, cls_w_ref, cls_b_ref,
                   logits_ref, h_scratch, ctx_scratch):
    layer = pl.program_id(0)
    scale = 1.0 / math.sqrt(HEAD_DIM)

    # -- layer 0: embedding LayerNorm seeds the VMEM-resident hidden state --
    @pl.when(layer == 0)
    def _():
        h_scratch[...] = _layernorm(x_ref[...].astype(jnp.float32),
                                    emb_g_ref[...], emb_b_ref[...])

    h = h_scratch[...]                                   # (B*S, H) f32, resident

    # -- fused QKV projection: one MXU matmul with N = 3*H --
    qkv = jnp.dot(h, qkv_w_ref[...],
                  preferred_element_type=jnp.float32) + qkv_b_ref[...]
    q = qkv[:, 0:HIDDEN]
    k = qkv[:, HIDDEN:2 * HIDDEN]
    v = qkv[:, 2 * HIDDEN:3 * HIDDEN]

    mask = mask_ref[...]                                 # (B, S) additive mask

    # -- attention: heads are lane-slices of the (B*S, H) layout; no transposes --
    for b in range(BATCH):
        r0, r1 = b * SEQ, (b + 1) * SEQ
        m_row = mask[b:b + 1, :]                         # (1, S) -> bcast over queries
        for hh in range(N_HEADS):
            c0, c1 = hh * HEAD_DIM, (hh + 1) * HEAD_DIM
            qh = q[r0:r1, c0:c1]
            kh = k[r0:r1, c0:c1]
            vh = v[r0:r1, c0:c1]
            s = jnp.dot(qh, kh.T, preferred_element_type=jnp.float32) * scale
            s = s + m_row
            s = s - s.max(axis=-1, keepdims=True)
            p = jnp.exp(s)
            p = p * pl.reciprocal(p.sum(axis=-1, keepdims=True), approx=True)
            ctx_scratch[r0:r1, c0:c1] = jnp.dot(
                p, vh, preferred_element_type=jnp.float32)

    ctx = ctx_scratch[...]                               # (B*S, H)

    # -- o-projection + residual + LayerNorm1 (fused epilogue) --
    attn_out = jnp.dot(ctx, o_w_ref[...],
                       preferred_element_type=jnp.float32) + o_b_ref[...]
    h1 = _layernorm(attn_out + h, ln1_g_ref[...], ln1_b_ref[...])

    # -- FFN + residual + LayerNorm2 (fused epilogue) --
    inter = jnp.dot(h1, i_w_ref[...],
                    preferred_element_type=jnp.float32) + i_b_ref[...]
    # TODO(synk): BERT uses erf-GELU; tanh approximation used for TPU lowering.
    inter = jax.nn.gelu(inter, approximate=True)
    ffn = jnp.dot(inter, f_w_ref[...],
                  preferred_element_type=jnp.float32) + f_b_ref[...]
    h2 = _layernorm(ffn + h1, ln2_g_ref[...], ln2_b_ref[...])
    h_scratch[...] = h2

    # -- last layer: pooler (tanh on CLS token) + classifier, fused --
    @pl.when(layer == N_LAYERS - 1)
    def _():
        for b in range(BATCH):
            cls_tok = h2[b * SEQ:b * SEQ + 1, :]         # (1, H) CLS row
            pooled = jnp.tanh(
                jnp.dot(cls_tok, pool_w_ref[...],
                        preferred_element_type=jnp.float32) + pool_b_ref[...])
            logits_ref[b:b + 1, :] = (
                jnp.dot(pooled, cls_w_ref[...],
                        preferred_element_type=jnp.float32) + cls_b_ref[...]
            ).astype(logits_ref.dtype)


def encoder_and_classify(params, x_emb, add_mask):
    def const_spec(a):
        return pl.BlockSpec(a.shape, lambda l: (0,) * a.ndim)

    def stacked_spec(a):
        return pl.BlockSpec((None,) + a.shape[1:], lambda l: (l, 0, 0))

    in_arrays = [
        x_emb, add_mask,
        params["emb_ln_g"], params["emb_ln_b"],
        params["qkv_w"], params["qkv_b"],
        params["o_w"], params["o_b"],
        params["ln1_g"], params["ln1_b"],
        params["i_w"], params["i_b"],
        params["f_w"], params["f_b"],
        params["ln2_g"], params["ln2_b"],
        params["pool_w"], params["pool_b"],
        params["cls_w"], params["cls_b"],
    ]
    in_specs = [
        const_spec(x_emb), const_spec(add_mask),
        const_spec(params["emb_ln_g"]), const_spec(params["emb_ln_b"]),
        stacked_spec(params["qkv_w"]), stacked_spec(params["qkv_b"]),
        stacked_spec(params["o_w"]), stacked_spec(params["o_b"]),
        stacked_spec(params["ln1_g"]), stacked_spec(params["ln1_b"]),
        stacked_spec(params["i_w"]), stacked_spec(params["i_b"]),
        stacked_spec(params["f_w"]), stacked_spec(params["f_b"]),
        stacked_spec(params["ln2_g"]), stacked_spec(params["ln2_b"]),
        const_spec(params["pool_w"]), const_spec(params["pool_b"]),
        const_spec(params["cls_w"]), const_spec(params["cls_b"]),
    ]

    return pl.pallas_call(
        encoder_kernel,
        out_shape=jax.ShapeDtypeStruct((BATCH, NUM_CLASSES), jnp.float32),
        grid_spec=pltpu.PrefetchScalarGridSpec(
            num_scalar_prefetch=0,
            grid=(N_LAYERS,),
            in_specs=in_specs,
            out_specs=pl.BlockSpec((BATCH, NUM_CLASSES), lambda l: (0, 0)),
            scratch_shapes=[
                pltpu.VMEM((BS, HIDDEN), jnp.float32),   # resident hidden state h
                pltpu.VMEM((BS, HIDDEN), jnp.float32),   # attention context ctx
            ],
        ),
        compiler_params=pltpu.CompilerParams(
            dimension_semantics=("arbitrary",),          # layers are sequential
        ),
    )(*in_arrays)


# ---------------- deterministic parameter construction ----------------
def dense_init(key, d_in, d_out):
    w = jax.random.normal(key, (d_in, d_out), jnp.float32) * 0.02
    b = jnp.zeros((d_out,), jnp.float32)
    return w, b


def init_params(key):
    keys = jax.random.split(key, 8 + N_LAYERS)
    p = {
        "word_emb": jax.random.normal(keys[0], (VOCAB, HIDDEN), jnp.float32) * 0.02,
        "pos_emb": jax.random.normal(keys[1], (MAX_POS, HIDDEN), jnp.float32) * 0.02,
        "type_emb": jax.random.normal(keys[2], (TYPE_VOCAB, HIDDEN), jnp.float32) * 0.02,
        "emb_ln_g": jnp.ones((1, HIDDEN), jnp.float32),
        "emb_ln_b": jnp.zeros((1, HIDDEN), jnp.float32),
    }
    pw, pb = dense_init(keys[3], HIDDEN, HIDDEN)
    cw, cb = dense_init(keys[4], HIDDEN, NUM_CLASSES)
    p["pool_w"], p["pool_b"] = pw, pb.reshape(1, HIDDEN)
    p["cls_w"], p["cls_b"] = cw, cb.reshape(1, NUM_CLASSES)

    stk = {n: [] for n in ("qkv_w", "qkv_b", "o_w", "o_b", "ln1_g", "ln1_b",
                           "i_w", "i_b", "f_w", "f_b", "ln2_g", "ln2_b")}
    for li in range(N_LAYERS):
        lk = jax.random.split(keys[8 + li], 6)
        qw, qb = dense_init(lk[0], HIDDEN, HIDDEN)
        kw, kb = dense_init(lk[1], HIDDEN, HIDDEN)
        vw, vb = dense_init(lk[2], HIDDEN, HIDDEN)
        ow, ob = dense_init(lk[3], HIDDEN, HIDDEN)
        iw, ib = dense_init(lk[4], HIDDEN, INTERMEDIATE)
        fw, fb = dense_init(lk[5], INTERMEDIATE, HIDDEN)
        stk["qkv_w"].append(jnp.concatenate([qw, kw, vw], axis=1))
        stk["qkv_b"].append(jnp.concatenate([qb, kb, vb]).reshape(1, 3 * HIDDEN))
        stk["o_w"].append(ow)
        stk["o_b"].append(ob.reshape(1, HIDDEN))
        stk["i_w"].append(iw)
        stk["i_b"].append(ib.reshape(1, INTERMEDIATE))
        stk["f_w"].append(fw)
        stk["f_b"].append(fb.reshape(1, HIDDEN))
        stk["ln1_g"].append(jnp.ones((1, HIDDEN), jnp.float32))
        stk["ln1_b"].append(jnp.zeros((1, HIDDEN), jnp.float32))
        stk["ln2_g"].append(jnp.ones((1, HIDDEN), jnp.float32))
        stk["ln2_b"].append(jnp.zeros((1, HIDDEN), jnp.float32))
    for n, lst in stk.items():
        p[n] = jnp.stack(lst, axis=0)
    return p


# ---------------- BERT forward (only embedding gather is JAX glue) ----------------
def bert_classifier_forward(params, input_ids, attention_mask):
    B, S = input_ids.shape
    # HF-style additive mask: (1 - mask) * -1e4, broadcast over heads & query pos
    add_mask = (1.0 - attention_mask.astype(jnp.float32)) * -10000.0     # (B, S)

    we = jnp.take(params["word_emb"], input_ids, axis=0)                 # (B, S, H)
    pe = params["pos_emb"][:S][None, :, :]
    te = params["type_emb"][0][None, None, :]                            # token_type_ids == 0
    x_emb = (we + pe + te).reshape(B * S, HIDDEN)

    return encoder_and_classify(params, x_emb, add_mask)                 # (B, num_classes)


# TODO(synk): BertModel.from_pretrained weight loading is replaced by deterministic
#             random initialization (synthetic kernel, no checkpoint).

if __name__ == "__main__":
    key = jax.random.PRNGKey(0)
    pkey, ikey = jax.random.split(key)
    params = init_params(pkey)

    input_ids = jax.random.randint(ikey, (BATCH, SEQ), 0, VOCAB, dtype=jnp.int32)
    attention_mask = jnp.ones((BATCH, SEQ), dtype=jnp.int32).at[1, SEQ - 2:].set(0)

    fwd = jax.jit(bert_classifier_forward)
    logits = fwd(params, input_ids, attention_mask)
    jax.block_until_ready(logits)

    assert logits.shape == (BATCH, NUM_CLASSES)
    assert bool(jnp.all(jnp.isfinite(logits)))
    print("KERNEL_OK")
</pallas_src>

<mosaic_0001>
module attributes {stable_mosaic.version = 11 : i64} {
  func.func @encoder_kernel(%arg0: i32, %arg1: memref<16x32xf32, #tpu.memory_space<vmem>>, %arg2: memref<2x8xf32, #tpu.memory_space<vmem>>, %arg3: memref<1x32xf32, #tpu.memory_space<vmem>>, %arg4: memref<1x32xf32, #tpu.memory_space<vmem>>, %arg5: memref<1x32x96xf32, #tpu.memory_space<vmem>>, %arg6: memref<1x1x96xf32, #tpu.memory_space<vmem>>, %arg7: memref<1x32x32xf32, #tpu.memory_space<vmem>>, %arg8: memref<1x1x32xf32, #tpu.memory_space<vmem>>, %arg9: memref<1x1x32xf32, #tpu.memory_space<vmem>>, %arg10: memref<1x1x32xf32, #tpu.memory_space<vmem>>, %arg11: memref<1x32x64xf32, #tpu.memory_space<vmem>>, %arg12: memref<1x1x64xf32, #tpu.memory_space<vmem>>, %arg13: memref<1x64x32xf32, #tpu.memory_space<vmem>>, %arg14: memref<1x1x32xf32, #tpu.memory_space<vmem>>, %arg15: memref<1x1x32xf32, #tpu.memory_space<vmem>>, %arg16: memref<1x1x32xf32, #tpu.memory_space<vmem>>, %arg17: memref<32x32xf32, #tpu.memory_space<vmem>>, %arg18: memref<1x32xf32, #tpu.memory_space<vmem>>, %arg19: memref<32x3xf32, #tpu.memory_space<vmem>>, %arg20: memref<1x3xf32, #tpu.memory_space<vmem>>, %arg21: memref<2x3xf32, #tpu.memory_space<vmem>>, %arg22: memref<16x32xf32, #tpu.memory_space<vmem>>, %arg23: memref<16x32xf32, #tpu.memory_space<vmem>>) attributes {dimension_semantics = [#tpu.dimension_semantics<arbitrary>], iteration_bounds = array<i64: 2>, scalar_prefetch = 0 : i64, scratch_operands = 2 : i64, tpu.core_type = #tpu.core_type<tc>, window_params = [{pipeline_mode = #tpu.pipeline_mode<synchronous>, transform_indices = @transform_0, window_bounds = array<i64: 16, 32>}, {pipeline_mode = #tpu.pipeline_mode<synchronous>, transform_indices = @transform_1, window_bounds = array<i64: 2, 8>}, {pipeline_mode = #tpu.pipeline_mode<synchronous>, transform_indices = @transform_2, window_bounds = array<i64: 1, 32>}, {pipeline_mode = #tpu.pipeline_mode<synchronous>, transform_indices = @transform_3, window_bounds = array<i64: 1, 32>}, {transform_indices = @transform_4, window_bounds = array<i64: 1, 32, 96>}, {transform_indices = @transform_5, window_bounds = array<i64: 1, 1, 96>}, {transform_indices = @transform_6, window_bounds = array<i64: 1, 32, 32>}, {transform_indices = @transform_7, window_bounds = array<i64: 1, 1, 32>}, {transform_indices = @transform_8, window_bounds = array<i64: 1, 1, 32>}, {transform_indices = @transform_9, window_bounds = array<i64: 1, 1, 32>}, {transform_indices = @transform_10, window_bounds = array<i64: 1, 32, 64>}, {transform_indices = @transform_11, window_bounds = array<i64: 1, 1, 64>}, {transform_indices = @transform_12, window_bounds = array<i64: 1, 64, 32>}, {transform_indices = @transform_13, window_bounds = array<i64: 1, 1, 32>}, {transform_indices = @transform_14, window_bounds = array<i64: 1, 1, 32>}, {transform_indices = @transform_15, window_bounds = array<i64: 1, 1, 32>}, {pipeline_mode = #tpu.pipeline_mode<synchronous>, transform_indices = @transform_16, window_bounds = array<i64: 32, 32>}, {pipeline_mode = #tpu.pipeline_mode<synchronous>, transform_indices = @transform_17, window_bounds = array<i64: 1, 32>}, {pipeline_mode = #tpu.pipeline_mode<synchronous>, transform_indices = @transform_18, window_bounds = array<i64: 32, 3>}, {pipeline_mode = #tpu.pipeline_mode<synchronous>, transform_indices = @transform_19, window_bounds = array<i64: 1, 3>}, {pipeline_mode = #tpu.pipeline_mode<synchronous>, transform_indices = @transform_20, window_bounds = array<i64: 2, 3>}]} {
    %c0_i32 = arith.constant 0 : i32
    %0 = arith.cmpi eq, %arg0, %c0_i32 : i32
    %1 = arith.extui %0 : i1 to i32
    %c0_i32_0 = arith.constant 0 : i32
    %2 = arith.cmpi ne, %1, %c0_i32_0 : i32
    scf.if %2 {
      %c0_115 = arith.constant 0 : index
      %c0_116 = arith.constant 0 : index
      %278 = vector.load %arg1[%c0_115, %c0_116] : memref<16x32xf32, #tpu.memory_space<vmem>>, vector<16x32xf32>
      %c0_117 = arith.constant 0 : index
      %c0_118 = arith.constant 0 : index
      %279 = vector.load %arg3[%c0_117, %c0_118] : memref<1x32xf32, #tpu.memory_space<vmem>>, vector<1x32xf32>
      %c0_119 = arith.constant 0 : index
      %c0_120 = arith.constant 0 : index
      %280 = vector.load %arg4[%c0_119, %c0_120] : memref<1x32xf32, #tpu.memory_space<vmem>>, vector<1x32xf32>
      %cst_121 = arith.constant dense<0.000000e+00> : vector<16xf32>
      %281 = vector.multi_reduction <add>, %278, %cst_121 [1] : vector<16x32xf32> to vector<16xf32>
      %282 = vector.shape_cast %281 : vector<16xf32> to vector<16x1xf32>
      %cst_122 = arith.constant 3.200000e+01 : f32
      %283 = vector.broadcast %cst_122 : f32 to vector<16x1xf32>
      %284 = arith.divf %282, %283 : vector<16x1xf32>
      %285 = vector.broadcast %284 : vector<16x1xf32> to vector<16x32xf32>
      %286 = arith.subf %278, %285 : vector<16x32xf32>
      %287 = arith.mulf %286, %286 : vector<16x32xf32>
      %cst_123 = arith.constant dense<0.000000e+00> : vector<16xf32>
      %288 = vector.multi_reduction <add>, %287, %cst_123 [1] : vector<16x32xf32> to vector<16xf32>
      %289 = vector.shape_cast %288 : vector<16xf32> to vector<16x1xf32>
      %cst_124 = arith.constant 3.200000e+01 : f32
      %290 = vector.broadcast %cst_124 : f32 to vector<16x1xf32>
      %291 = arith.divf %289, %290 : vector<16x1xf32>
      %292 = vector.broadcast %284 : vector<16x1xf32> to vector<16x32xf32>
      %293 = arith.subf %278, %292 : vector<16x32xf32>
      %cst_125 = arith.constant 9.99999996E-13 : f32
      %294 = vector.broadcast %cst_125 : f32 to vector<16x1xf32>
      %295 = arith.addf %291, %294 : vector<16x1xf32>
      %296 = math.rsqrt %295 : vector<16x1xf32>
      %297 = vector.broadcast %296 : vector<16x1xf32> to vector<16x32xf32>
      %298 = arith.mulf %293, %297 : vector<16x32xf32>
      %299 = vector.broadcast %279 : vector<1x32xf32> to vector<16x32xf32>
      %300 = arith.mulf %298, %299 : vector<16x32xf32>
      %301 = vector.broadcast %280 : vector<1x32xf32> to vector<16x32xf32>
      %302 = arith.addf %300, %301 : vector<16x32xf32>
      %c0_126 = arith.constant 0 : index
      %c0_127 = arith.constant 0 : index
      %303 = vector.load %arg22[%c0_126, %c0_127] : memref<16x32xf32, #tpu.memory_space<vmem>>, vector<16x32xf32>
      tpu.vector_store %arg22[%c0_126, %c0_127], %302 {strides = array<i32>} : memref<16x32xf32, #tpu.memory_space<vmem>>, vector<16x32xf32>,
    } else {
    }
    %c0 = arith.constant 0 : index
    %c0_1 = arith.constant 0 : index
    %3 = vector.load %arg22[%c0, %c0_1] : memref<16x32xf32, #tpu.memory_space<vmem>>, vector<16x32xf32>
    %c0_2 = arith.constant 0 : index
    %c0_3 = arith.constant 0 : index
    %c0_4 = arith.constant 0 : index
    %4 = vector.load %arg5[%c0_2, %c0_3, %c0_4] : memref<1x32x96xf32, #tpu.memory_space<vmem>>, vector<1x32x96xf32>
    %5 = vector.shape_cast %4 : vector<1x32x96xf32> to vector<32x96xf32>
    %cst = arith.constant dense<0.000000e+00> : vector<16x96xf32>
    %6 = tpu.matmul %3, %5, %cst {dimension_numbers = #tpu.dot_dimension_numbers<[1], [0], [0], [1], [0, 0, 1, 1], [], []>} : vector<16x32xf32>, vector<32x96xf32>, vector<16x96xf32> -> vector<16x96xf32>
    %c0_5 = arith.constant 0 : index
    %c0_6 = arith.constant 0 : index
    %c0_7 = arith.constant 0 : index
    %7 = vector.load %arg6[%c0_5, %c0_6, %c0_7] : memref<1x1x96xf32, #tpu.memory_space<vmem>>, vector<1x1x96xf32>
    %8 = vector.shape_cast %7 : vector<1x1x96xf32> to vector<1x96xf32>
    %9 = vector.broadcast %8 : vector<1x96xf32> to vector<16x96xf32>
    %10 = arith.addf %6, %9 : vector<16x96xf32>
    %11 = vector.extract_strided_slice %10 {offsets = [0, 0], sizes = [16, 32], strides = [1, 1]} : vector<16x96xf32> to vector<16x32xf32>
    %12 = vector.extract_strided_slice %10 {offsets = [0, 32], sizes = [16, 32], strides = [1, 1]} : vector<16x96xf32> to vector<16x32xf32>
    %13 = vector.extract_strided_slice %10 {offsets = [0, 64], sizes = [16, 32], strides = [1, 1]} : vector<16x96xf32> to vector<16x32xf32>
    %c0_8 = arith.constant 0 : index
    %c0_9 = arith.constant 0 : index
    %14 = vector.load %arg2[%c0_8, %c0_9] : memref<2x8xf32, #tpu.memory_space<vmem>>, vector<2x8xf32>
    %15 = vector.extract_strided_slice %14 {offsets = [0, 0], sizes = [1, 8], strides = [1, 1]} : vector<2x8xf32> to vector<1x8xf32>
    %16 = vector.extract_strided_slice %11 {offsets = [0, 0], sizes = [8, 8], strides = [1, 1]} : vector<16x32xf32> to vector<8x8xf32>
    %17 = vector.extract_strided_slice %12 {offsets = [0, 0], sizes = [8, 8], strides = [1, 1]} : vector<16x32xf32> to vector<8x8xf32>
    %18 = vector.extract_strided_slice %13 {offsets = [0, 0], sizes = [8, 8], strides = [1, 1]} : vector<16x32xf32> to vector<8x8xf32>
    %19 = tpu.transpose %17, [1, 0] : vector<8x8xf32> -> vector<8x8xf32>
    %cst_10 = arith.constant dense<0.000000e+00> : vector<8x8xf32>
    %20 = tpu.matmul %16, %19, %cst_10 {dimension_numbers = #tpu.dot_dimension_numbers<[1], [0], [0], [1], [0, 0, 1, 1], [], []>} : vector<8x8xf32>, vector<8x8xf32>, vector<8x8xf32> -> vector<8x8xf32>
    %cst_11 = arith.constant 0.353553385 : f32
    %21 = vector.broadcast %cst_11 : f32 to vector<8x8xf32>
    %22 = arith.mulf %20, %21 : vector<8x8xf32>
    %23 = vector.broadcast %15 : vector<1x8xf32> to vector<8x8xf32>
    %24 = arith.addf %22, %23 : vector<8x8xf32>
    %cst_12 = arith.constant dense<0xFF800000> : vector<8xf32>
    %25 = vector.multi_reduction <maximumf>, %24, %cst_12 [1] : vector<8x8xf32> to vector<8xf32>
    %26 = vector.shape_cast %25 : vector<8xf32> to vector<8x1xf32>
    %27 = vector.broadcast %26 : vector<8x1xf32> to vector<8x8xf32>
    %28 = arith.subf %24, %27 : vector<8x8xf32>
    %29 = math.exp %28 : vector<8x8xf32>
    %cst_13 = arith.constant dense<0.000000e+00> : vector<8xf32>
    %30 = vector.multi_reduction <add>, %29, %cst_13 [1] : vector<8x8xf32> to vector<8xf32>
    %31 = vector.shape_cast %30 : vector<8xf32> to vector<8x1xf32>
    %32 = tpu.reciprocal %31 {approx = true} : vector<8x1xf32> -> vector<8x1xf32>
    %33 = vector.broadcast %32 : vector<8x1xf32> to vector<8x8xf32>
    %34 = arith.mulf %29, %33 : vector<8x8xf32>
    %cst_14 = arith.constant dense<0.000000e+00> : vector<8x8xf32>
    %35 = tpu.matmul %34, %18, %cst_14 {dimension_numbers = #tpu.dot_dimension_numbers<[1], [0], [0], [1], [0, 0, 1, 1], [], []>} : vector<8x8xf32>, vector<8x8xf32>, vector<8x8xf32> -> vector<8x8xf32>
    %c0_15 = arith.constant 0 : index
    %c0_16 = arith.constant 0 : index
    %36 = vector.load %arg23[%c0_15, %c0_16] : memref<16x32xf32, #tpu.memory_space<vmem>>, vector<8x8xf32>
    tpu.vector_store %arg23[%c0_15, %c0_16], %35 {strides = array<i32>} : memref<16x32xf32, #tpu.memory_space<vmem>>, vector<8x8xf32>,
    %37 = vector.extract_strided_slice %11 {offsets = [0, 8], sizes = [8, 8], strides = [1, 1]} : vector<16x32xf32> to vector<8x8xf32>
    %38 = vector.extract_strided_slice %12 {offsets = [0, 8], sizes = [8, 8], strides = [1, 1]} : vector<16x32xf32> to vector<8x8xf32>
    %39 = vector.extract_strided_slice %13 {offsets = [0, 8], sizes = [8, 8], strides = [1, 1]} : vector<16x32xf32> to vector<8x8xf32>
    %40 = tpu.transpose %38, [1, 0] : vector<8x8xf32> -> vector<8x8xf32>
    %cst_17 = arith.constant dense<0.000000e+00> : vector<8x8xf32>
    %41 = tpu.matmul %37, %40, %cst_17 {dimension_numbers = #tpu.dot_dimension_numbers<[1], [0], [0], [1], [0, 0, 1, 1], [], []>} : vector<8x8xf32>, vector<8x8xf32>, vector<8x8xf32> -> vector<8x8xf32>
    %cst_18 = arith.constant 0.353553385 : f32
    %42 = vector.broadcast %cst_18 : f32 to vector<8x8xf32>
    %43 = arith.mulf %41, %42 : vector<8x8xf32>
    %44 = vector.broadcast %15 : vector<1x8xf32> to vector<8x8xf32>
    %45 = arith.addf %43, %44 : vector<8x8xf32>
    %cst_19 = arith.constant dense<0xFF800000> : vector<8xf32>
    %46 = vector.multi_reduction <maximumf>, %45, %cst_19 [1] : vector<8x8xf32> to vector<8xf32>
    %47 = vector.shape_cast %46 : vector<8xf32> to vector<8x1xf32>
    %48 = vector.broadcast %47 : vector<8x1xf32> to vector<8x8xf32>
    %49 = arith.subf %45, %48 : vector<8x8xf32>
    %50 = math.exp %49 : vector<8x8xf32>
    %cst_20 = arith.constant dense<0.000000e+00> : vector<8xf32>
    %51 = vector.multi_reduction <add>, %50, %cst_20 [1] : vector<8x8xf32> to vector<8xf32>
    %52 = vector.shape_cast %51 : vector<8xf32> to vector<8x1xf32>
    %53 = tpu.reciprocal %52 {approx = true} : vector<8x1xf32> -> vector<8x1xf32>
    %54 = vector.broadcast %53 : vector<8x1xf32> to vector<8x8xf32>
    %55 = arith.mulf %50, %54 : vector<8x8xf32>
    %cst_21 = arith.constant dense<0.000000e+00> : vector<8x8xf32>
    %56 = tpu.matmul %55, %39, %cst_21 {dimension_numbers = #tpu.dot_dimension_numbers<[1], [0], [0], [1], [0, 0, 1, 1], [], []>} : vector<8x8xf32>, vector<8x8xf32>, vector<8x8xf32> -> vector<8x8xf32>
    %c0_22 = arith.constant 0 : index
    %c8 = arith.constant 8 : index
    %57 = vector.load %arg23[%c0_22, %c8] : memref<16x32xf32, #tpu.memory_space<vmem>>, vector<8x8xf32>
    tpu.vector_store %arg23[%c0_22, %c8], %56 {strides = array<i32>} : memref<16x32xf32, #tpu.memory_space<vmem>>, vector<8x8xf32>,
    %58 = vector.extract_strided_slice %11 {offsets = [0, 16], sizes = [8, 8], strides = [1, 1]} : vector<16x32xf32> to vector<8x8xf32>
    %59 = vector.extract_strided_slice %12 {offsets = [0, 16], sizes = [8, 8], strides = [1, 1]} : vector<16x32xf32> to vector<8x8xf32>
    %60 = vector.extract_strided_slice %13 {offsets = [0, 16], sizes = [8, 8], strides = [1, 1]} : vector<16x32xf32> to vector<8x8xf32>
    %61 = tpu.transpose %59, [1, 0] : vector<8x8xf32> -> vector<8x8xf32>
    %cst_23 = arith.constant dense<0.000000e+00> : vector<8x8xf32>
    %62 = tpu.matmul %58, %61, %cst_23 {dimension_numbers = #tpu.dot_dimension_numbers<[1], [0], [0], [1], [0, 0, 1, 1], [], []>} : vector<8x8xf32>, vector<8x8xf32>, vector<8x8xf32> -> vector<8x8xf32>
    %cst_24 = arith.constant 0.353553385 : f32
    %63 = vector.broadcast %cst_24 : f32 to vector<8x8xf32>
    %64 = arith.mulf %62, %63 : vector<8x8xf32>
    %65 = vector.broadcast %15 : vector<1x8xf32> to vector<8x8xf32>
    %66 = arith.addf %64, %65 : vector<8x8xf32>
    %cst_25 = arith.constant dense<0xFF800000> : vector<8xf32>
    %67 = vector.multi_reduction <maximumf>, %66, %cst_25 [1] : vector<8x8xf32> to vector<8xf32>
    %68 = vector.shape_cast %67 : vector<8xf32> to vector<8x1xf32>
    %69 = vector.broadcast %68 : vector<8x1xf32> to vector<8x8xf32>
    %70 = arith.subf %66, %69 : vector<8x8xf32>
    %71 = math.exp %70 : vector<8x8xf32>
    %cst_26 = arith.constant dense<0.000000e+00> : vector<8xf32>
    %72 = vector.multi_reduction <add>, %71, %cst_26 [1] : vector<8x8xf32> to vector<8xf32>
    %73 = vector.shape_cast %72 : vector<8xf32> to vector<8x1xf32>
    %74 = tpu.reciprocal %73 {approx = true} : vector<8x1xf32> -> vector<8x1xf32>
    %75 = vector.broadcast %74 : vector<8x1xf32> to vector<8x8xf32>
    %76 = arith.mulf %71, %75 : vector<8x8xf32>
    %cst_27 = arith.constant dense<0.000000e+00> : vector<8x8xf32>
    %77 = tpu.matmul %76, %60, %cst_27 {dimension_numbers = #tpu.dot_dimension_numbers<[1], [0], [0], [1], [0, 0, 1, 1], [], []>} : vector<8x8xf32>, vector<8x8xf32>, vector<8x8xf32> -> vector<8x8xf32>
    %c0_28 = arith.constant 0 : index
    %c16 = arith.constant 16 : index
    %78 = vector.load %arg23[%c0_28, %c16] : memref<16x32xf32, #tpu.memory_space<vmem>>, vector<8x8xf32>
    tpu.vector_store %arg23[%c0_28, %c16], %77 {strides = array<i32>} : memref<16x32xf32, #tpu.memory_space<vmem>>, vector<8x8xf32>,
    %79 = vector.extract_strided_slice %11 {offsets = [0, 24], sizes = [8, 8], strides = [1, 1]} : vector<16x32xf32> to vector<8x8xf32>
    %80 = vector.extract_strided_slice %12 {offsets = [0, 24], sizes = [8, 8], strides = [1, 1]} : vector<16x32xf32> to vector<8x8xf32>
    %81 = vector.extract_strided_slice %13 {offsets = [0, 24], sizes = [8, 8], strides = [1, 1]} : vector<16x32xf32> to vector<8x8xf32>
    %82 = tpu.transpose %80, [1, 0] : vector<8x8xf32> -> vector<8x8xf32>
    %cst_29 = arith.constant dense<0.000000e+00> : vector<8x8xf32>
    %83 = tpu.matmul %79, %82, %cst_29 {dimension_numbers = #tpu.dot_dimension_numbers<[1], [0], [0], [1], [0, 0, 1, 1], [], []>} : vector<8x8xf32>, vector<8x8xf32>, vector<8x8xf32> -> vector<8x8xf32>
    %cst_30 = arith.constant 0.353553385 : f32
    %84 = vector.broadcast %cst_30 : f32 to vector<8x8xf32>
    %85 = arith.mulf %83, %84 : vector<8x8xf32>
    %86 = vector.broadcast %15 : vector<1x8xf32> to vector<8x8xf32>
    %87 = arith.addf %85, %86 : vector<8x8xf32>
    %cst_31 = arith.constant dense<0xFF800000> : vector<8xf32>
    %88 = vector.multi_reduction <maximumf>, %87, %cst_31 [1] : vector<8x8xf32> to vector<8xf32>
    %89 = vector.shape_cast %88 : vector<8xf32> to vector<8x1xf32>
    %90 = vector.broadcast %89 : vector<8x1xf32> to vector<8x8xf32>
    %91 = arith.subf %87, %90 : vector<8x8xf32>
    %92 = math.exp %91 : vector<8x8xf32>
    %cst_32 = arith.constant dense<0.000000e+00> : vector<8xf32>
    %93 = vector.multi_reduction <add>, %92, %cst_32 [1] : vector<8x8xf32> to vector<8xf32>
    %94 = vector.shape_cast %93 : vector<8xf32> to vector<8x1xf32>
    %95 = tpu.reciprocal %94 {approx = true} : vector<8x1xf32> -> vector<8x1xf32>
    %96 = vector.broadcast %95 : vector<8x1xf32> to vector<8x8xf32>
    %97 = arith.mulf %92, %96 : vector<8x8xf32>
    %cst_33 = arith.constant dense<0.000000e+00> : vector<8x8xf32>
    %98 = tpu.matmul %97, %81, %cst_33 {dimension_numbers = #tpu.dot_dimension_numbers<[1], [0], [0], [1], [0, 0, 1, 1], [], []>} : vector<8x8xf32>, vector<8x8xf32>, vector<8x8xf32> -> vector<8x8xf32>
    %c0_34 = arith.constant 0 : index
    %c24 = arith.constant 24 : index
    %99 = vector.load %arg23[%c0_34, %c24] : memref<16x32xf32, #tpu.memory_space<vmem>>, vector<8x8xf32>
    tpu.vector_store %arg23[%c0_34, %c24], %98 {strides = array<i32>} : memref<16x32xf32, #tpu.memory_space<vmem>>, vector<8x8xf32>,
    %100 = vector.extract_strided_slice %14 {offsets = [1, 0], sizes = [1, 8], strides = [1, 1]} : vector<2x8xf32> to vector<1x8xf32>
    %101 = vector.extract_strided_slice %11 {offsets = [8, 0], sizes = [8, 8], strides = [1, 1]} : vector<16x32xf32> to vector<8x8xf32>
    %102 = vector.extract_strided_slice %12 {offsets = [8, 0], sizes = [8, 8], strides = [1, 1]} : vector<16x32xf32> to vector<8x8xf32>
    %103 = vector.extract_strided_slice %13 {offsets = [8, 0], sizes = [8, 8], strides = [1, 1]} : vector<16x32xf32> to vector<8x8xf32>
    %104 = tpu.transpose %102, [1, 0] : vector<8x8xf32> -> vector<8x8xf32>
    %cst_35 = arith.constant dense<0.000000e+00> : vector<8x8xf32>
    %105 = tpu.matmul %101, %104, %cst_35 {dimension_numbers = #tpu.dot_dimension_numbers<[1], [0], [0], [1], [0, 0, 1, 1], [], []>} : vector<8x8xf32>, vector<8x8xf32>, vector<8x8xf32> -> vector<8x8xf32>
    %cst_36 = arith.constant 0.353553385 : f32
    %106 = vector.broadcast %cst_36 : f32 to vector<8x8xf32>
    %107 = arith.mulf %105, %106 : vector<8x8xf32>
    %108 = vector.broadcast %100 : vector<1x8xf32> to vector<8x8xf32>
    %109 = arith.addf %107, %108 : vector<8x8xf32>
    %cst_37 = arith.constant dense<0xFF800000> : vector<8xf32>
    %110 = vector.multi_reduction <maximumf>, %109, %cst_37 [1] : vector<8x8xf32> to vector<8xf32>
    %111 = vector.shape_cast %110 : vector<8xf32> to vector<8x1xf32>
    %112 = vector.broadcast %111 : vector<8x1xf32> to vector<8x8xf32>
    %113 = arith.subf %109, %112 : vector<8x8xf32>
    %114 = math.exp %113 : vector<8x8xf32>
    %cst_38 = arith.constant dense<0.000000e+00> : vector<8xf32>
    %115 = vector.multi_reduction <add>, %114, %cst_38 [1] : vector<8x8xf32> to vector<8xf32>
    %116 = vector.shape_cast %115 : vector<8xf32> to vector<8x1xf32>
    %117 = tpu.reciprocal %116 {approx = true} : vector<8x1xf32> -> vector<8x1xf32>
    %118 = vector.broadcast %117 : vector<8x1xf32> to vector<8x8xf32>
    %119 = arith.mulf %114, %118 : vector<8x8xf32>
    %cst_39 = arith.constant dense<0.000000e+00> : vector<8x8xf32>
    %120 = tpu.matmul %119, %103, %cst_39 {dimension_numbers = #tpu.dot_dimension_numbers<[1], [0], [0], [1], [0, 0, 1, 1], [], []>} : vector<8x8xf32>, vector<8x8xf32>, vector<8x8xf32> -> vector<8x8xf32>
    %c8_40 = arith.constant 8 : index
    %c0_41 = arith.constant 0 : index
    %121 = vector.load %arg23[%c8_40, %c0_41] : memref<16x32xf32, #tpu.memory_space<vmem>>, vector<8x8xf32>
    tpu.vector_store %arg23[%c8_40, %c0_41], %120 {strides = array<i32>} : memref<16x32xf32, #tpu.memory_space<vmem>>, vector<8x8xf32>,
    %122 = vector.extract_strided_slice %11 {offsets = [8, 8], sizes = [8, 8], strides = [1, 1]} : vector<16x32xf32> to vector<8x8xf32>
    %123 = vector.extract_strided_slice %12 {offsets = [8, 8], sizes = [8, 8], strides = [1, 1]} : vector<16x32xf32> to vector<8x8xf32>
    %124 = vector.extract_strided_slice %13 {offsets = [8, 8], sizes = [8, 8], strides = [1, 1]} : vector<16x32xf32> to vector<8x8xf32>
    %125 = tpu.transpose %123, [1, 0] : vector<8x8xf32> -> vector<8x8xf32>
    %cst_42 = arith.constant dense<0.000000e+00> : vector<8x8xf32>
    %126 = tpu.matmul %122, %125, %cst_42 {dimension_numbers = #tpu.dot_dimension_numbers<[1], [0], [0], [1], [0, 0, 1, 1], [], []>} : vector<8x8xf32>, vector<8x8xf32>, vector<8x8xf32> -> vector<8x8xf32>
    %cst_43 = arith.constant 0.353553385 : f32
    %127 = vector.broadcast %cst_43 : f32 to vector<8x8xf32>
    %128 = arith.mulf %126, %127 : vector<8x8xf32>
    %129 = vector.broadcast %100 : vector<1x8xf32> to vector<8x8xf32>
    %130 = arith.addf %128, %129 : vector<8x8xf32>
    %cst_44 = arith.constant dense<0xFF800000> : vector<8xf32>
    %131 = vector.multi_reduction <maximumf>, %130, %cst_44 [1] : vector<8x8xf32> to vector<8xf32>
    %132 = vector.shape_cast %131 : vector<8xf32> to vector<8x1xf32>
    %133 = vector.broadcast %132 : vector<8x1xf32> to vector<8x8xf32>
    %134 = arith.subf %130, %133 : vector<8x8xf32>
    %135 = math.exp %134 : vector<8x8xf32>
    %cst_45 = arith.constant dense<0.000000e+00> : vector<8xf32>
    %136 = vector.multi_reduction <add>, %135, %cst_45 [1] : vector<8x8xf32> to vector<8xf32>
    %137 = vector.shape_cast %136 : vector<8xf32> to vector<8x1xf32>
    %138 = tpu.reciprocal %137 {approx = true} : vector<8x1xf32> -> vector<8x1xf32>
    %139 = vector.broadcast %138 : vector<8x1xf32> to vector<8x8xf32>
    %140 = arith.mulf %135, %139 : vector<8x8xf32>
    %cst_46 = arith.constant dense<0.000000e+00> : vector<8x8xf32>
    %141 = tpu.matmul %140, %124, %cst_46 {dimension_numbers = #tpu.dot_dimension_numbers<[1], [0], [0], [1], [0, 0, 1, 1], [], []>} : vector<8x8xf32>, vector<8x8xf32>, vector<8x8xf32> -> vector<8x8xf32>
    %c8_47 = arith.constant 8 : index
    %c8_48 = arith.constant 8 : index
    %142 = vector.load %arg23[%c8_47, %c8_48] : memref<16x32xf32, #tpu.memory_space<vmem>>, vector<8x8xf32>
    tpu.vector_store %arg23[%c8_47, %c8_48], %141 {strides = array<i32>} : memref<16x32xf32, #tpu.memory_space<vmem>>, vector<8x8xf32>,
    %143 = vector.extract_strided_slice %11 {offsets = [8, 16], sizes = [8, 8], strides = [1, 1]} : vector<16x32xf32> to vector<8x8xf32>
    %144 = vector.extract_strided_slice %12 {offsets = [8, 16], sizes = [8, 8], strides = [1, 1]} : vector<16x32xf32> to vector<8x8xf32>
    %145 = vector.extract_strided_slice %13 {offsets = [8, 16], sizes = [8, 8], strides = [1, 1]} : vector<16x32xf32> to vector<8x8xf32>
    %146 = tpu.transpose %144, [1, 0] : vector<8x8xf32> -> vector<8x8xf32>
    %cst_49 = arith.constant dense<0.000000e+00> : vector<8x8xf32>
    %147 = tpu.matmul %143, %146, %cst_49 {dimension_numbers = #tpu.dot_dimension_numbers<[1], [0], [0], [1], [0, 0, 1, 1], [], []>} : vector<8x8xf32>, vector<8x8xf32>, vector<8x8xf32> -> vector<8x8xf32>
    %cst_50 = arith.constant 0.353553385 : f32
    %148 = vector.broadcast %cst_50 : f32 to vector<8x8xf32>
    %149 = arith.mulf %147, %148 : vector<8x8xf32>
    %150 = vector.broadcast %100 : vector<1x8xf32> to vector<8x8xf32>
    %151 = arith.addf %149, %150 : vector<8x8xf32>
    %cst_51 = arith.constant dense<0xFF800000> : vector<8xf32>
    %152 = vector.multi_reduction <maximumf>, %151, %cst_51 [1] : vector<8x8xf32> to vector<8xf32>
    %153 = vector.shape_cast %152 : vector<8xf32> to vector<8x1xf32>
    %154 = vector.broadcast %153 : vector<8x1xf32> to vector<8x8xf32>
    %155 = arith.subf %151, %154 : vector<8x8xf32>
    %156 = math.exp %155 : vector<8x8xf32>
    %cst_52 = arith.constant dense<0.000000e+00> : vector<8xf32>
    %157 = vector.multi_reduction <add>, %156, %cst_52 [1] : vector<8x8xf32> to vector<8xf32>
    %158 = vector.shape_cast %157 : vector<8xf32> to vector<8x1xf32>
    %159 = tpu.reciprocal %158 {approx = true} : vector<8x1xf32> -> vector<8x1xf32>
    %160 = vector.broadcast %159 : vector<8x1xf32> to vector<8x8xf32>
    %161 = arith.mulf %156, %160 : vector<8x8xf32>
    %cst_53 = arith.constant dense<0.000000e+00> : vector<8x8xf32>
    %162 = tpu.matmul %161, %145, %cst_53 {dimension_numbers = #tpu.dot_dimension_numbers<[1], [0], [0], [1], [0, 0, 1, 1], [], []>} : vector<8x8xf32>, vector<8x8xf32>, vector<8x8xf32> -> vector<8x8xf32>
    %c8_54 = arith.constant 8 : index
    %c16_55 = arith.constant 16 : index
    %163 = vector.load %arg23[%c8_54, %c16_55] : memref<16x32xf32, #tpu.memory_space<vmem>>, vector<8x8xf32>
    tpu.vector_store %arg23[%c8_54, %c16_55], %162 {strides = array<i32>} : memref<16x32xf32, #tpu.memory_space<vmem>>, vector<8x8xf32>,
    %164 = vector.extract_strided_slice %11 {offsets = [8, 24], sizes = [8, 8], strides = [1, 1]} : vector<16x32xf32> to vector<8x8xf32>
    %165 = vector.extract_strided_slice %12 {offsets = [8, 24], sizes = [8, 8], strides = [1, 1]} : vector<16x32xf32> to vector<8x8xf32>
    %166 = vector.extract_strided_slice %13 {offsets = [8, 24], sizes = [8, 8], strides = [1, 1]} : vector<16x32xf32> to vector<8x8xf32>
    %167 = tpu.transpose %165, [1, 0] : vector<8x8xf32> -> vector<8x8xf32>
    %cst_56 = arith.constant dense<0.000000e+00> : vector<8x8xf32>
    %168 = tpu.matmul %164, %167, %cst_56 {dimension_numbers = #tpu.dot_dimension_numbers<[1], [0], [0], [1], [0, 0, 1, 1], [], []>} : vector<8x8xf32>, vector<8x8xf32>, vector<8x8xf32> -> vector<8x8xf32>
    %cst_57 = arith.constant 0.353553385 : f32
    %169 = vector.broadcast %cst_57 : f32 to vector<8x8xf32>
    %170 = arith.mulf %168, %169 : vector<8x8xf32>
    %171 = vector.broadcast %100 : vector<1x8xf32> to vector<8x8xf32>
    %172 = arith.addf %170, %171 : vector<8x8xf32>
    %cst_58 = arith.constant dense<0xFF800000> : vector<8xf32>
    %173 = vector.multi_reduction <maximumf>, %172, %cst_58 [1] : vector<8x8xf32> to vector<8xf32>
    %174 = vector.shape_cast %173 : vector<8xf32> to vector<8x1xf32>
    %175 = vector.broadcast %174 : vector<8x1xf32> to vector<8x8xf32>
    %176 = arith.subf %172, %175 : vector<8x8xf32>
    %177 = math.exp %176 : vector<8x8xf32>
    %cst_59 = arith.constant dense<0.000000e+00> : vector<8xf32>
    %178 = vector.multi_reduction <add>, %177, %cst_59 [1] : vector<8x8xf32> to vector<8xf32>
    %179 = vector.shape_cast %178 : vector<8xf32> to vector<8x1xf32>
    %180 = tpu.reciprocal %179 {approx = true} : vector<8x1xf32> -> vector<8x1xf32>
    %181 = vector.broadcast %180 : vector<8x1xf32> to vector<8x8xf32>
    %182 = arith.mulf %177, %181 : vector<8x8xf32>
    %cst_60 = arith.constant dense<0.000000e+00> : vector<8x8xf32>
    %183 = tpu.matmul %182, %166, %cst_60 {dimension_numbers = #tpu.dot_dimension_numbers<[1], [0], [0], [1], [0, 0, 1, 1], [], []>} : vector<8x8xf32>, vector<8x8xf32>, vector<8x8xf32> -> vector<8x8xf32>
    %c8_61 = arith.constant 8 : index
    %c24_62 = arith.constant 24 : index
    %184 = vector.load %arg23[%c8_61, %c24_62] : memref<16x32xf32, #tpu.memory_space<vmem>>, vector<8x8xf32>
    tpu.vector_store %arg23[%c8_61, %c24_62], %183 {strides = array<i32>} : memref<16x32xf32, #tpu.memory_space<vmem>>, vector<8x8xf32>,
    %c0_63 = arith.constant 0 : index
    %c0_64 = arith.constant 0 : index
    %185 = vector.load %arg23[%c0_63, %c0_64] : memref<16x32xf32, #tpu.memory_space<vmem>>, vector<16x32xf32>
    %c0_65 = arith.constant 0 : index
    %c0_66 = arith.constant 0 : index
    %c0_67 = arith.constant 0 : index
    %186 = vector.load %arg7[%c0_65, %c0_66, %c0_67] : memref<1x32x32xf32, #tpu.memory_space<vmem>>, vector<1x32x32xf32>
    %187 = vector.shape_cast %186 : vector<1x32x32xf32> to vector<32x32xf32>
    %cst_68 = arith.constant dense<0.000000e+00> : vector<16x32xf32>
    %188 = tpu.matmul %185, %187, %cst_68 {dimension_numbers = #tpu.dot_dimension_numbers<[1], [0], [0], [1], [0, 0, 1, 1], [], []>} : vector<16x32xf32>, vector<32x32xf32>, vector<16x32xf32> -> vector<16x32xf32>
    %c0_69 = arith.constant 0 : index
    %c0_70 = arith.constant 0 : index
    %c0_71 = arith.constant 0 : index
    %189 = vector.load %arg8[%c0_69, %c0_70, %c0_71] : memref<1x1x32xf32, #tpu.memory_space<vmem>>, vector<1x1x32xf32>
    %190 = vector.shape_cast %189 : vector<1x1x32xf32> to vector<1x32xf32>
    %191 = vector.broadcast %190 : vector<1x32xf32> to vector<16x32xf32>
    %192 = arith.addf %188, %191 : vector<16x32xf32>
    %193 = arith.addf %192, %3 : vector<16x32xf32>
    %c0_72 = arith.constant 0 : index
    %c0_73 = arith.constant 0 : index
    %c0_74 = arith.constant 0 : index
    %194 = vector.load %arg9[%c0_72, %c0_73, %c0_74] : memref<1x1x32xf32, #tpu.memory_space<vmem>>, vector<1x1x32xf32>
    %195 = vector.shape_cast %194 : vector<1x1x32xf32> to vector<1x32xf32>
    %c0_75 = arith.constant 0 : index
    %c0_76 = arith.constant 0 : index
    %c0_77 = arith.constant 0 : index
    %196 = vector.load %arg10[%c0_75, %c0_76, %c0_77] : memref<1x1x32xf32, #tpu.memory_space<vmem>>, vector<1x1x32xf32>
    %197 = vector.shape_cast %196 : vector<1x1x32xf32> to vector<1x32xf32>
    %cst_78 = arith.constant dense<0.000000e+00> : vector<16xf32>
    %198 = vector.multi_reduction <add>, %193, %cst_78 [1] : vector<16x32xf32> to vector<16xf32>
    %199 = vector.shape_cast %198 : vector<16xf32> to vector<16x1xf32>
    %cst_79 = arith.constant 3.200000e+01 : f32
    %200 = vector.broadcast %cst_79 : f32 to vector<16x1xf32>
    %201 = arith.divf %199, %200 : vector<16x1xf32>
    %202 = vector.broadcast %201 : vector<16x1xf32> to vector<16x32xf32>
    %203 = arith.subf %193, %202 : vector<16x32xf32>
    %204 = arith.mulf %203, %203 : vector<16x32xf32>
    %cst_80 = arith.constant dense<0.000000e+00> : vector<16xf32>
    %205 = vector.multi_reduction <add>, %204, %cst_80 [1] : vector<16x32xf32> to vector<16xf32>
    %206 = vector.shape_cast %205 : vector<16xf32> to vector<16x1xf32>
    %cst_81 = arith.constant 3.200000e+01 : f32
    %207 = vector.broadcast %cst_81 : f32 to vector<16x1xf32>
    %208 = arith.divf %206, %207 : vector<16x1xf32>
    %209 = vector.broadcast %201 : vector<16x1xf32> to vector<16x32xf32>
    %210 = arith.subf %193, %209 : vector<16x32xf32>
    %cst_82 = arith.constant 9.99999996E-13 : f32
    %211 = vector.broadcast %cst_82 : f32 to vector<16x1xf32>
    %212 = arith.addf %208, %211 : vector<16x1xf32>
    %213 = math.rsqrt %212 : vector<16x1xf32>
    %214 = vector.broadcast %213 : vector<16x1xf32> to vector<16x32xf32>
    %215 = arith.mulf %210, %214 : vector<16x32xf32>
    %216 = vector.broadcast %195 : vector<1x32xf32> to vector<16x32xf32>
    %217 = arith.mulf %215, %216 : vector<16x32xf32>
    %218 = vector.broadcast %197 : vector<1x32xf32> to vector<16x32xf32>
    %219 = arith.addf %217, %218 : vector<16x32xf32>
    %c0_83 = arith.constant 0 : index
    %c0_84 = arith.constant 0 : index
    %c0_85 = arith.constant 0 : index
    %220 = vector.load %arg11[%c0_83, %c0_84, %c0_85] : memref<1x32x64xf32, #tpu.memory_space<vmem>>, vector<1x32x64xf32>
    %221 = vector.shape_cast %220 : vector<1x32x64xf32> to vector<32x64xf32>
    %cst_86 = arith.constant dense<0.000000e+00> : vector<16x64xf32>
    %222 = tpu.matmul %219, %221, %cst_86 {dimension_numbers = #tpu.dot_dimension_numbers<[1], [0], [0], [1], [0, 0, 1, 1], [], []>} : vector<16x32xf32>, vector<32x64xf32>, vector<16x64xf32> -> vector<16x64xf32>
    %c0_87 = arith.constant 0 : index
    %c0_88 = arith.constant 0 : index
    %c0_89 = arith.constant 0 : index
    %223 = vector.load %arg12[%c0_87, %c0_88, %c0_89] : memref<1x1x64xf32, #tpu.memory_space<vmem>>, vector<1x1x64xf32>
    %224 = vector.shape_cast %223 : vector<1x1x64xf32> to vector<1x64xf32>
    %225 = vector.broadcast %224 : vector<1x64xf32> to vector<16x64xf32>
    %226 = arith.addf %222, %225 : vector<16x64xf32>
    %227 = arith.mulf %226, %226 : vector<16x64xf32>
    %228 = arith.mulf %226, %227 : vector<16x64xf32>
    %cst_90 = arith.constant 4.471500e-02 : f32
    %229 = vector.broadcast %cst_90 : f32 to vector<16x64xf32>
    %230 = arith.mulf %229, %228 : vector<16x64xf32>
    %231 = arith.addf %226, %230 : vector<16x64xf32>
    %cst_91 = arith.constant 0.797884583 : f32
    %232 = vector.broadcast %cst_91 : f32 to vector<16x64xf32>
    %233 = arith.mulf %232, %231 : vector<16x64xf32>
    %234 = math.tanh %233 : vector<16x64xf32>
    %cst_92 = arith.constant 1.000000e+00 : f32
    %235 = vector.broadcast %cst_92 : f32 to vector<16x64xf32>
    %236 = arith.addf %235, %234 : vector<16x64xf32>
    %cst_93 = arith.constant 5.000000e-01 : f32
    %237 = vector.broadcast %cst_93 : f32 to vector<16x64xf32>
    %238 = arith.mulf %237, %236 : vector<16x64xf32>
    %239 = arith.mulf %226, %238 : vector<16x64xf32>
    %c0_94 = arith.constant 0 : index
    %c0_95 = arith.constant 0 : index
    %c0_96 = arith.constant 0 : index
    %240 = vector.load %arg13[%c0_94, %c0_95, %c0_96] : memref<1x64x32xf32, #tpu.memory_space<vmem>>, vector<1x64x32xf32>
    %241 = vector.shape_cast %240 : vector<1x64x32xf32> to vector<64x32xf32>
    %cst_97 = arith.constant dense<0.000000e+00> : vector<16x32xf32>
    %242 = tpu.matmul %239, %241, %cst_97 {dimension_numbers = #tpu.dot_dimension_numbers<[1], [0], [0], [1], [0, 0, 1, 1], [], []>} : vector<16x64xf32>, vector<64x32xf32>, vector<16x32xf32> -> vector<16x32xf32>
    %c0_98 = arith.constant 0 : index
    %c0_99 = arith.constant 0 : index
    %c0_100 = arith.constant 0 : index
    %243 = vector.load %arg14[%c0_98, %c0_99, %c0_100] : memref<1x1x32xf32, #tpu.memory_space<vmem>>, vector<1x1x32xf32>
    %244 = vector.shape_cast %243 : vector<1x1x32xf32> to vector<1x32xf32>
    %245 = vector.broadcast %244 : vector<1x32xf32> to vector<16x32xf32>
    %246 = arith.addf %242, %245 : vector<16x32xf32>
    %247 = arith.addf %246, %219 : vector<16x32xf32>
    %c0_101 = arith.constant 0 : index
    %c0_102 = arith.constant 0 : index
    %c0_103 = arith.constant 0 : index
    %248 = vector.load %arg15[%c0_101, %c0_102, %c0_103] : memref<1x1x32xf32, #tpu.memory_space<vmem>>, vector<1x1x32xf32>
    %249 = vector.shape_cast %248 : vector<1x1x32xf32> to vector<1x32xf32>
    %c0_104 = arith.constant 0 : index
    %c0_105 = arith.constant 0 : index
    %c0_106 = arith.constant 0 : index
    %250 = vector.load %arg16[%c0_104, %c0_105, %c0_106] : memref<1x1x32xf32, #tpu.memory_space<vmem>>, vector<1x1x32xf32>
    %251 = vector.shape_cast %250 : vector<1x1x32xf32> to vector<1x32xf32>
    %cst_107 = arith.constant dense<0.000000e+00> : vector<16xf32>
    %252 = vector.multi_reduction <add>, %247, %cst_107 [1] : vector<16x32xf32> to vector<16xf32>
    %253 = vector.shape_cast %252 : vector<16xf32> to vector<16x1xf32>
    %cst_108 = arith.constant 3.200000e+01 : f32
    %254 = vector.broadcast %cst_108 : f32 to vector<16x1xf32>
    %255 = arith.divf %253, %254 : vector<16x1xf32>
    %256 = vector.broadcast %255 : vector<16x1xf32> to vector<16x32xf32>
    %257 = arith.subf %247, %256 : vector<16x32xf32>
    %258 = arith.mulf %257, %257 : vector<16x32xf32>
    %cst_109 = arith.constant dense<0.000000e+00> : vector<16xf32>
    %259 = vector.multi_reduction <add>, %258, %cst_109 [1] : vector<16x32xf32> to vector<16xf32>
    %260 = vector.shape_cast %259 : vector<16xf32> to vector<16x1xf32>
    %cst_110 = arith.constant 3.200000e+01 : f32
    %261 = vector.broadcast %cst_110 : f32 to vector<16x1xf32>
    %262 = arith.divf %260, %261 : vector<16x1xf32>
    %263 = vector.broadcast %255 : vector<16x1xf32> to vector<16x32xf32>
    %264 = arith.subf %247, %263 : vector<16x32xf32>
    %cst_111 = arith.constant 9.99999996E-13 : f32
    %265 = vector.broadcast %cst_111 : f32 to vector<16x1xf32>
    %266 = arith.addf %262, %265 : vector<16x1xf32>
    %267 = math.rsqrt %266 : vector<16x1xf32>
    %268 = vector.broadcast %267 : vector<16x1xf32> to vector<16x32xf32>
    %269 = arith.mulf %264, %268 : vector<16x32xf32>
    %270 = vector.broadcast %249 : vector<1x32xf32> to vector<16x32xf32>
    %271 = arith.mulf %269, %270 : vector<16x32xf32>
    %272 = vector.broadcast %251 : vector<1x32xf32> to vector<16x32xf32>
    %273 = arith.addf %271, %272 : vector<16x32xf32>
    %c0_112 = arith.constant 0 : index
    %c0_113 = arith.constant 0 : index
    %274 = vector.load %arg22[%c0_112, %c0_113] : memref<16x32xf32, #tpu.memory_space<vmem>>, vector<16x32xf32>
    tpu.vector_store %arg22[%c0_112, %c0_113], %273 {strides = array<i32>} : memref<16x32xf32, #tpu.memory_space<vmem>>, vector<16x32xf32>,
    %c1_i32 = arith.constant 1 : i32
    %275 = arith.cmpi eq, %arg0, %c1_i32 : i32
    %276 = arith.extui %275 : i1 to i32
    %c0_i32_114 = arith.constant 0 : i32
    %277 = arith.cmpi ne, %276, %c0_i32_114 : i32
    scf.if %277 {
      %278 = vector.extract_strided_slice %273 {offsets = [0, 0], sizes = [1, 32], strides = [1, 1]} : vector<16x32xf32> to vector<1x32xf32>
      %c0_115 = arith.constant 0 : index
      %c0_116 = arith.constant 0 : index
      %279 = vector.load %arg17[%c0_115, %c0_116] : memref<32x32xf32, #tpu.memory_space<vmem>>, vector<32x32xf32>
      %cst_117 = arith.constant dense<0.000000e+00> : vector<1x32xf32>
      %280 = tpu.matmul %278, %279, %cst_117 {dimension_numbers = #tpu.dot_dimension_numbers<[1], [0], [0], [1], [0, 0, 1, 1], [], []>} : vector<1x32xf32>, vector<32x32xf32>, vector<1x32xf32> -> vector<1x32xf32>
      %c0_118 = arith.constant 0 : index
      %c0_119 = arith.constant 0 : index
      %281 = vector.load %arg18[%c0_118, %c0_119] : memref<1x32xf32, #tpu.memory_space<vmem>>, vector<1x32xf32>
      %282 = arith.addf %280, %281 : vector<1x32xf32>
      %283 = math.tanh %282 : vector<1x32xf32>
      %c0_120 = arith.constant 0 : index
      %c0_121 = arith.constant 0 : index
      %284 = vector.load %arg19[%c0_120, %c0_121] : memref<32x3xf32, #tpu.memory_space<vmem>>, vector<32x3xf32>
      %cst_122 = arith.constant dense<0.000000e+00> : vector<1x3xf32>
      %285 = tpu.matmul %283, %284, %cst_122 {dimension_numbers = #tpu.dot_dimension_numbers<[1], [0], [0], [1], [0, 0, 1, 1], [], []>} : vector<1x32xf32>, vector<32x3xf32>, vector<1x3xf32> -> vector<1x3xf32>
      %c0_123 = arith.constant 0 : index
      %c0_124 = arith.constant 0 : index
      %286 = vector.load %arg20[%c0_123, %c0_124] : memref<1x3xf32, #tpu.memory_space<vmem>>, vector<1x3xf32>
      %287 = arith.addf %285, %286 : vector<1x3xf32>
      %c0_125 = arith.constant 0 : index
      %c0_126 = arith.constant 0 : index
      %288 = vector.load %arg21[%c0_125, %c0_126] : memref<2x3xf32, #tpu.memory_space<vmem>>, vector<1x3xf32>
      tpu.vector_store %arg21[%c0_125, %c0_126], %287 {strides = array<i32>} : memref<2x3xf32, #tpu.memory_space<vmem>>, vector<1x3xf32>,
      %289 = vector.extract_strided_slice %273 {offsets = [8, 0], sizes = [1, 32], strides = [1, 1]} : vector<16x32xf32> to vector<1x32xf32>
      %c0_127 = arith.constant 0 : index
      %c0_128 = arith.constant 0 : index
      %290 = vector.load %arg17[%c0_127, %c0_128] : memref<32x32xf32, #tpu.memory_space<vmem>>, vector<32x32xf32>
      %cst_129 = arith.constant dense<0.000000e+00> : vector<1x32xf32>
      %291 = tpu.matmul %289, %290, %cst_129 {dimension_numbers = #tpu.dot_dimension_numbers<[1], [0], [0], [1], [0, 0, 1, 1], [], []>} : vector<1x32xf32>, vector<32x32xf32>, vector<1x32xf32> -> vector<1x32xf32>
      %c0_130 = arith.constant 0 : index
      %c0_131 = arith.constant 0 : index
      %292 = vector.load %arg18[%c0_130, %c0_131] : memref<1x32xf32, #tpu.memory_space<vmem>>, vector<1x32xf32>
      %293 = arith.addf %291, %292 : vector<1x32xf32>
      %294 = math.tanh %293 : vector<1x32xf32>
      %c0_132 = arith.constant 0 : index
      %c0_133 = arith.constant 0 : index
      %295 = vector.load %arg19[%c0_132, %c0_133] : memref<32x3xf32, #tpu.memory_space<vmem>>, vector<32x3xf32>
      %cst_134 = arith.constant dense<0.000000e+00> : vector<1x3xf32>
      %296 = tpu.matmul %294, %295, %cst_134 {dimension_numbers = #tpu.dot_dimension_numbers<[1], [0], [0], [1], [0, 0, 1, 1], [], []>} : vector<1x32xf32>, vector<32x3xf32>, vector<1x3xf32> -> vector<1x3xf32>
      %c0_135 = arith.constant 0 : index
      %c0_136 = arith.constant 0 : index
      %297 = vector.load %arg20[%c0_135, %c0_136] : memref<1x3xf32, #tpu.memory_space<vmem>>, vector<1x3xf32>
      %298 = arith.addf %296, %297 : vector<1x3xf32>
      %c1 = arith.constant 1 : index
      %c0_137 = arith.constant 0 : index
      %299 = vector.load %arg21[%c1, %c0_137] : memref<2x3xf32, #tpu.memory_space<vmem>>, vector<1x3xf32>
      tpu.vector_store %arg21[%c1, %c0_137], %298 {strides = array<i32>} : memref<2x3xf32, #tpu.memory_space<vmem>>, vector<1x3xf32>,
    } else {
    }
    return
  }
  func.func @transform_0(%arg0: i32) -> (i32, i32) {
    %c0_i32 = arith.constant 0 : i32
    %c0_i32_0 = arith.constant 0 : i32
    %c0_i32_1 = arith.constant 0 : i32
    return %c0_i32, %c0_i32_0 : i32, i32
  }
  func.func @transform_1(%arg0: i32) -> (i32, i32) {
    %c0_i32 = arith.constant 0 : i32
    %c0_i32_0 = arith.constant 0 : i32
    %c0_i32_1 = arith.constant 0 : i32
    return %c0_i32, %c0_i32_0 : i32, i32
  }
  func.func @transform_2(%arg0: i32) -> (i32, i32) {
    %c0_i32 = arith.constant 0 : i32
    %c0_i32_0 = arith.constant 0 : i32
    %c0_i32_1 = arith.constant 0 : i32
    return %c0_i32, %c0_i32_0 : i32, i32
  }
  func.func @transform_3(%arg0: i32) -> (i32, i32) {
    %c0_i32 = arith.constant 0 : i32
    %c0_i32_0 = arith.constant 0 : i32
    %c0_i32_1 = arith.constant 0 : i32
    return %c0_i32, %c0_i32_0 : i32, i32
  }
  func.func @transform_4(%arg0: i32) -> (i32, i32, i32) {
    %c0_i32 = arith.constant 0 : i32
    %c0_i32_0 = arith.constant 0 : i32
    %c0_i32_1 = arith.constant 0 : i32
    return %arg0, %c0_i32, %c0_i32_0 : i32, i32, i32
  }
  func.func @transform_5(%arg0: i32) -> (i32, i32, i32) {
    %c0_i32 = arith.constant 0 : i32
    %c0_i32_0 = arith.constant 0 : i32
    %c0_i32_1 = arith.constant 0 : i32
    return %arg0, %c0_i32, %c0_i32_0 : i32, i32, i32
  }
  func.func @transform_6(%arg0: i32) -> (i32, i32, i32) {
    %c0_i32 = arith.constant 0 : i32
    %c0_i32_0 = arith.constant 0 : i32
    %c0_i32_1 = arith.constant 0 : i32
    return %arg0, %c0_i32, %c0_i32_0 : i32, i32, i32
  }
  func.func @transform_7(%arg0: i32) -> (i32, i32, i32) {
    %c0_i32 = arith.constant 0 : i32
    %c0_i32_0 = arith.constant 0 : i32
    %c0_i32_1 = arith.constant 0 : i32
    return %arg0, %c0_i32, %c0_i32_0 : i32, i32, i32
  }
  func.func @transform_8(%arg0: i32) -> (i32, i32, i32) {
    %c0_i32 = arith.constant 0 : i32
    %c0_i32_0 = arith.constant 0 : i32
    %c0_i32_1 = arith.constant 0 : i32
    return %arg0, %c0_i32, %c0_i32_0 : i32, i32, i32
  }
  func.func @transform_9(%arg0: i32) -> (i32, i32, i32) {
    %c0_i32 = arith.constant 0 : i32
    %c0_i32_0 = arith.constant 0 : i32
    %c0_i32_1 = arith.constant 0 : i32
    return %arg0, %c0_i32, %c0_i32_0 : i32, i32, i32
  }
  func.func @transform_10(%arg0: i32) -> (i32, i32, i32) {
    %c0_i32 = arith.constant 0 : i32
    %c0_i32_0 = arith.constant 0 : i32
    %c0_i32_1 = arith.constant 0 : i32
    return %arg0, %c0_i32, %c0_i32_0 : i32, i32, i32
  }
  func.func @transform_11(%arg0: i32) -> (i32, i32, i32) {
    %c0_i32 = arith.constant 0 : i32
    %c0_i32_0 = arith.constant 0 : i32
    %c0_i32_1 = arith.constant 0 : i32
    return %arg0, %c0_i32, %c0_i32_0 : i32, i32, i32
  }
  func.func @transform_12(%arg0: i32) -> (i32, i32, i32) {
    %c0_i32 = arith.constant 0 : i32
    %c0_i32_0 = arith.constant 0 : i32
    %c0_i32_1 = arith.constant 0 : i32
    return %arg0, %c0_i32, %c0_i32_0 : i32, i32, i32
  }
  func.func @transform_13(%arg0: i32) -> (i32, i32, i32) {
    %c0_i32 = arith.constant 0 : i32
    %c0_i32_0 = arith.constant 0 : i32
    %c0_i32_1 = arith.constant 0 : i32
    return %arg0, %c0_i32, %c0_i32_0 : i32, i32, i32
  }
  func.func @transform_14(%arg0: i32) -> (i32, i32, i32) {
    %c0_i32 = arith.constant 0 : i32
    %c0_i32_0 = arith.constant 0 : i32
    %c0_i32_1 = arith.constant 0 : i32
    return %arg0, %c0_i32, %c0_i32_0 : i32, i32, i32
  }
  func.func @transform_15(%arg0: i32) -> (i32, i32, i32) {
    %c0_i32 = arith.constant 0 : i32
    %c0_i32_0 = arith.constant 0 : i32
    %c0_i32_1 = arith.constant 0 : i32
    return %arg0, %c0_i32, %c0_i32_0 : i32, i32, i32
  }
  func.func @transform_16(%arg0: i32) -> (i32, i32) {
    %c0_i32 = arith.constant 0 : i32
    %c0_i32_0 = arith.constant 0 : i32
    %c0_i32_1 = arith.constant 0 : i32
    return %c0_i32, %c0_i32_0 : i32, i32
  }
  func.func @transform_17(%arg0: i32) -> (i32, i32) {
    %c0_i32 = arith.constant 0 : i32
    %c0_i32_0 = arith.constant 0 : i32
    %c0_i32_1 = arith.constant 0 : i32
    return %c0_i32, %c0_i32_0 : i32, i32
  }
  func.func @transform_18(%arg0: i32) -> (i32, i32) {
    %c0_i32 = arith.constant 0 : i32
    %c0_i32_0 = arith.constant 0 : i32
    %c0_i32_1 = arith.constant 0 : i32
    return %c0_i32, %c0_i32_0 : i32, i32
  }
  func.func @transform_19(%arg0: i32) -> (i32, i32) {
    %c0_i32 = arith.constant 0 : i32
    %c0_i32_0 = arith.constant 0 : i32
    %c0_i32_1 = arith.constant 0 : i32
    return %c0_i32, %c0_i32_0 : i32, i32
  }
  func.func @transform_20(%arg0: i32) -> (i32, i32) {
    %c0_i32 = arith.constant 0 : i32
    %c0_i32_0 = arith.constant 0 : i32
    %c0_i32_1 = arith.constant 0 : i32
    return %c0_i32, %c0_i32_0 : i32, i32
  }
}

</mosaic_0001>

<bundles_post_ra>
// kernel: bert_classifier_forward.1
= control target key start
LH: loop header
LB: loop body
LE: loop exit
PB: predicated region body
PF: predicated region fallthrough
CT: control target
= control target key end

     0   :  { %s4214_s0 = inlined_call_operand.vmem [shape: f32[16,32], index: 0, kind: input, shape index: {}]   ;;  %s4215_s1 = inlined_call_operand.vmem [shape: f32[2,8], index: 1, kind: input, shape index: {}]   ;;  %s4216_s2 = inlined_call_operand.vmem [shape: f32[1,32], index: 2, kind: input, shape index: {}]   ;;  %s4217_s3 = inlined_call_operand.vmem [shape: f32[1,32], index: 3, kind: input, shape index: {}]   ;;  %s4218_s4 = inlined_call_operand.vmem [shape: f32[2,32,96], index: 4, kind: input, shape index: {}]   ;;  %s4219_s5 = inlined_call_operand.vmem [shape: f32[2,1,96], index: 5, kind: input, shape index: {}]   ;;  %s4220_s6 = inlined_call_operand.vmem [shape: f32[2,32,32], index: 6, kind: input, shape index: {}]   ;;  %s4221_s7 = inlined_call_operand.vmem [shape: f32[2,1,32], index: 7, kind: input, shape index: {}]   ;;  %s4222_s8 = inlined_call_operand.vmem [shape: f32[2,1,32], index: 8, kind: input, shape index: {}]   ;;  %s4223_s9 = inlined_call_operand.vmem [shape: f32[2,1,32], index: 9, kind: input, shape index: {}]   ;;  %s4224_s10 = inlined_call_operand.vmem [shape: f32[2,32,64], index: 10, kind: input, shape index: {}]   ;;  %s4225_s11 = inlined_call_operand.vmem [shape: f32[2,1,64], index: 11, kind: input, shape index: {}]   ;;  %s4226_s12 = inlined_call_operand.vmem [shape: f32[2,64,32], index: 12, kind: input, shape index: {}]   ;;  %s4227_s13 = inlined_call_operand.vmem [shape: f32[2,1,32], index: 13, kind: input, shape index: {}]   ;;  %s4228_s14 = inlined_call_operand.vmem [shape: f32[2,1,32], index: 14, kind: input, shape index: {}]   ;;  %s4229_s15 = inlined_call_operand.vmem [shape: f32[2,1,32], index: 15, kind: input, shape index: {}]   ;;  %s4230_s16 = inlined_call_operand.vmem [shape: f32[32,32], index: 16, kind: input, shape index: {}]   ;;  %s4231_s17 = inlined_call_operand.vmem [shape: f32[1,32], index: 17, kind: input, shape index: {}]   ;;  %s4232_s18 = inlined_call_operand.vmem [shape: f32[32,3], index: 18, kind: input, shape index: {}]   ;;  %s4233_s19 = inlined_call_operand.vmem [shape: f32[1,3], index: 19, kind: input, shape index: {}]   ;;  %s4234_s20 = inlined_call_operand.hbm [shape: f32[2,3], index: 20, kind: output, shape index: {}]  }
   0x1   :  { %4242 = sst [smem:[#allocation8_spill]] %s4214_s0 }
   0x2   :  { %4243 = sst [smem:[#allocation9_spill]] %s4215_s1 }
   0x3   :  { %4244 = sst [smem:[#allocation10_spill]] %s4216_s2 }
   0x4   :  { %4245 = sst [smem:[#allocation11_spill]] %s4217_s3 }
   0x5   :  { %4246 = sst [smem:[#allocation12_spill]] %s4218_s4 }
   0x6   :  { %4247 = sst [smem:[#allocation13_spill]] %s4220_s6 }
   0x7   :  { %4248 = sst [smem:[#allocation14_spill]] %s4230_s16 }
   0x8   :  { %4249 = sst [smem:[#allocation15_spill]] %s4231_s17 }
   0x9   :  { %4250 = sst [smem:[#allocation16_spill]] %s4232_s18 }
   0xa   :  { %4251 = sst [smem:[#allocation17_spill]] %s4233_s19 }
   0xb   :  { %4252 = sst [smem:[#allocation18_spill]] %s4234_s20 }
   0xc   :  { %25 = vsyncpa [#allocation5], 0  ;;  %s3824_s1 = smov 0  }
   0xd LB: > { %4253 = sst [smem:[#allocation7_spill]] %s3697_s1  ;;  %s3830_s22 = sadd.s32 4294967295, %s3697_s1   ;;  %s3697_s1 = sphi %s3824_s1, %s31_s1  }
   0xe   : > { %p3190_p0 = scmp.ge.s32.totalorder %s3697_s1, 1  ;;  %p652_p1 = scmp.lt.s32.totalorder %s3697_s1, 3 }
  0x10   : > { %p653_p2 = pnand %p3190_p0, %p652_p1 }
  0x11   : > { %p744_p3 = scmp.lt.s32.totalorder (!%p653_p2), %s3830_s22, 1  ;;  %s4254_s28 = sld [smem:[#allocation12_spill]] (!%p653_p2) }
  0x12   : > { %656 = sbr.rel (%p653_p2) target bundleno = 3419 (0xd5b), region = 100  ;;  %s4255_s6 = sld [smem:[#allocation13_spill]] (!%p653_p2) }
  0x13   : > { %p3199_p4 = scmp.ne.s32.totalorder (!%p653_p2), %s3830_s22, 0 }
  0x19   : > { %s3836_s23 = scalar_select %p744_p3, %s3830_s22, 1 }
  0x1a   : > { %791 = sbr.rel (%p3199_p4) target bundleno = 351 (0x15f), region = 104  ;;  %s4256_s1 = sld [smem:[#allocation8_spill]] (!%p3199_p4)  ;;  %vm796_vm0 = vcmask (!%p3199_p4), 261120  }
  0x1b   : > { %s3251_s24 = sshll.u32 %s3836_s23, 5  ;;  %s3254_s16 = sshll.u32 %s3836_s23, 6 }
  0x1c   : > { %s3846_s4 = scalar_lea.vmem %s4254_s28, %s3251_s24  ;;  %s3851_s0 = scalar_lea.vmem %s4255_s6, %s3251_s24 }
  0x1d   : > { %s3868_s28 = scalar_lea.vmem %s4224_s10, %s3251_s24  ;;  %s3878_s20 = scalar_lea.vmem %s4226_s12, %s3254_s16 }
  0x1e   : > { %s781_s2 = scalar_lea.vmem %s4227_s13, %s3836_s23  ;;  %s784_s26 = scalar_lea.vmem %s4228_s14, %s3836_s23 }
  0x1f   : > { %s787_s18 = scalar_lea.vmem %s4229_s15, %s3836_s23  ;;  %s4258_s17 = sld [smem:[#allocation10_spill]] (!%p3199_p4) }
  0x20   : > { %s4257_s21 = smov (!%p3199_p4), %s4256_s1  ;;  %v792_v0 = vld [vmem:[%s4256_s1] sm:$0xff] (!%p3199_p4)  ;;  %s4259_s24 = sld [smem:[#allocation11_spill]] (!%p3199_p4) }
  0x21   : > { %v793_v1 = vld [vmem:[%s4257_s21 + $0x8] sm:$0xff]  ;;  %v797_v2 = vsel %vm796_vm0, %v792_v0, 0.0 }
  0x22   : > { %798 = vadd.xlane.f32.xlu0 %v797_v2  ;;  %v800_v3 = vsel %vm796_vm0, %v793_v1, 0.0 }
  0x25   : > { %v3200_v21 = vld [vmem:[%s4258_s17] ss:$0 sm:$0xff] }
  0x26   : > { %801 = vadd.xlane.f32.xlu0 %v800_v3  ;;  %v3201_v23 = vld [vmem:[%s4259_s24] ss:$0 sm:$0xff] }
  0xaf   : > { %v799_v4 = vpop.xlane.xlu0 %798 }
  0xb0   : > { %v804_v5 = vmul.f32 0.03125, %v799_v4 }
  0xb2   : > { %v806_v6 = vsub.f32 %v792_v0, %v804_v5 }
  0xb3   : > { %v802_v7 = vpop.xlane.xlu0 %801 }
  0xb4   : > { %v805_v8 = vmul.f32 0.03125, %v802_v7  ;;  %v808_v9 = vmul.f32 %v806_v6, %v806_v6 }
  0xb6   : > { %v807_v10 = vsub.f32 %v793_v1, %v805_v8  ;;  %v810_v11 = vsel %vm796_vm0, %v808_v9, 0.0 }
  0xb7   : > { %811 = vadd.xlane.f32.xlu1 %v810_v11 }
  0xb8   : > { %v809_v12 = vmul.f32 %v807_v10, %v807_v10 }
  0xba   : > { %v813_v13 = vsel %vm796_vm0, %v809_v12, 0.0 }
  0xbb   : > { %814 = vadd.xlane.f32.xlu1 %v813_v13 }
 0x144   : > { %v812_v14 = vpop.xlane.xlu1 %811 }
 0x145   : > { %v816_v15 = vmul.f32 0.03125, %v812_v14 }
 0x147   : > { %v818_v16 = vadd.f32 1e-12, %v816_v15 }
 0x148   : > { %v815_v17 = vpop.xlane.xlu1 %814 }
 0x149   : > { %3609 = vrsqrt.f32 %v818_v16  ;;  %v817_v18 = vmul.f32 0.03125, %v815_v17 }
 0x14b   : > { %v819_v19 = vadd.f32 1e-12, %v817_v18 }
 0x14d   : > { %3611 = vrsqrt.f32 %v819_v19 }
 0x153   : > { %v3610_v20 = vpop.eup %3609 }
 0x154   : > { %v822_v22 = vmul.f32 %v3610_v20, %v806_v6 }
 0x156   : > { %v830_v24 = vmul.f32 %v3200_v21, %v822_v22 }
 0x157   : > { %v3612_v25 = vpop.eup %3611 }
 0x158   : > { %v838_v26 = vadd.f32 %v3201_v23, %v830_v24  ;;  %v823_v27 = vmul.f32 %v3612_v25, %v807_v10 }
 0x15a   : > { %840 = vst.msk [vmem:[#allocation2] sm:$0xff] %vm796_vm0, %v838_v26  ;;  %v831_v28 = vmul.f32 %v3200_v21, %v823_v27 }
 0x15c   : > { %v839_v29 = vadd.f32 %v3201_v23, %v831_v28 }
 0x15e   : > { %841 = vst.msk [vmem:[#allocation2 + $0x8] sm:$0xff] %vm796_vm0, %v839_v29 }
 0x15f PF: > { %v844_v30 = vld [vmem:[%s3846_s4] sm:$0xff]  ;;  %v845_v31 = vld [vmem:[%s3846_s4 + $0x8] sm:$0xff]  ;;  %v846_v32 = vld [vmem:[%s3846_s4 + $0x10] sm:$0xff]  ;;  %vm855_vm1 = vcmask 261120   ;;  %v3699_v38 = vmov 0.0   ;;  %vm3700_vm2 = vmmov 0   ;;  %s4260_s29 = scalar_lea.vmem %s4219_s5, %s3836_s23  ;;  %v1017_v59 = vlaneseq }
 0x160   : > { %v3511_v33 = vpack.c.bf16 %v845_v31, %v844_v30  ;;  %v847_v34 = vld [vmem:[%s3846_s4 + $0x18] sm:$0xff]  ;;  %3356 = vmatprep.subr.mxu0 %v3699_v38  ;;  %3358 = vmatprep.mubr.msk.f32.mxu0 %vm3700_vm2, %v3699_v38  ;;  %v3202_v39 = vld [vmem:[%s4260_s29] ss:$0 sm:$0xff]  ;;  %s3701_s30 = smov 120   ;;  %s3702_s1 = smov 96   ;;  %vm941_vm3 = vcmask 64512  }
 0x161   : > { %v3915_v35 = vld [vmem:[#allocation2] sm:$0xff]  ;;  %v3515_v36 = vpack.c.bf16 %v847_v34, %v846_v32  ;;  %s3703_s16 = smov 80   ;;  %s3704_s6 = smov 88   ;;  %v1018_v60 = vshrl.u32 %v1017_v59, 7  ;;  %vm1281_vm4 = vcmask 130112   ;;  %vm1454_vm5 = vcmask 195712  }
 0x162   : > { %3343 = vmatprep.mubr.msk.f32.mxu1 %vm855_vm1, %v3915_v35  ;;  %3512 = vmatprep.subr.bf16.mxu1 %v3511_v33  ;;  %s3705_s3 = smov 72   ;;  %s3706_s17 = smov 112   ;;  %vm1627_vm6 = vcmask 261312   ;;  %vm2582_vm7 = vcmask 523264  }
 0x163   : > { %3514 = vmatpush3.bf16.msra.mxu1 %v3511_v33  ;;  %s3707_s19 = smov 104   ;;  %s3708_s25 = smov 56   ;;  %v1019_v61 = vsub.s32 0, %v1018_v60  ;;  %v1709_v14 = vsub.s32 1, %v1018_v60 }
 0x164   : > { %3516 = vmatprep.subr.bf16.mxu1 %v3515_v36  ;;  %s3709_s24 = smov 64   ;;  %s4261_s29 = sld [smem:[#allocation9_spill]] }
 0x165   : > { %v3919_v37 = vld [vmem:[#allocation2 + $0x8] sm:$0xff]  ;;  %s4263_s4 = scalar_lea.vmem %s4222_s8, %s3836_s23  ;;  %p3242_p5 = scmp.ne.s32.totalorder %s3830_s22, 1 }
 0x166   : > { %vm3716_vm8 = vmmov (!%p3242_p5), 0   ;;  %s4270_s27 = sld [smem:[#allocation17_spill]] (!%p3242_p5)  ;;  %vm2873_vm9 = vcmask (!%p3242_p5), 16384  }
 0x167   : > { %3518 = vmatpush3.bf16.msra.mxu1 %v3515_v36 }
 0x168   : > { %3346 = vmatprep.subr.mxu1 %v3699_v38 }
 0x16a   : > { %3344 = vmatmul.mubr.msk.f32.vlgmr.msra.gmra.mrb[0].mxu1 %vm855_vm1, %v3919_v37  ;;  %v937_v62 = vld [vmem:[%s4261_s29] sm:$0x3]  ;;  %s4264_s29 = scalar_lea.vmem %s4223_s9, %s3836_s23 }
 0x16b   : > { %3348 = vmatprep.mubr.msk.f32.mxu1 %vm3700_vm2, %v3699_v38  ;;  %v1020_v63 = vrot.slane %v937_v62, %v1019_v61  ;;  %v1710_v20 = vrot.slane %v937_v62, %v1709_v14 }
 0x23d   : > { %v3345_v40 = vpop.f32.mrb[0].mxu1 }
 0x23e   : > { %v928_v41 = vpop.f32.mrb[1].mxu1  ;;  %v3942_v43 = vadd.f32 %v3345_v40, %v3202_v39 }
 0x23f   : > { %v3934_v42 = vadd.f32 %v3202_v39, %v928_v41 }
 0x241   : > { %1110 = vrot.lane.b32.xlu1 %v3934_v42, %s3701_s30  ;;  %939 = vrot.lane.b32.xlu0 %v3934_v42, %s3702_s1 }
 0x245   : > { %1285 = vrot.lane.b32.xlu1 %v3934_v42, %s3703_s16  ;;  %1112 = vrot.lane.b32.xlu0 %v3934_v42, %s3704_s6 }
 0x249   : > { %1458 = vrot.lane.b32.xlu1 %v3934_v42, %s3705_s3  ;;  %1283 = vrot.lane.b32.xlu0 %v3934_v42, %s3706_s17 }
 0x24d   : > { %1630 = vrot.lane.b32.xlu1 %v3942_v43, %s3702_s1  ;;  %1456 = vrot.lane.b32.xlu0 %v3934_v42, %s3707_s19  ;;  %s3711_s1 = smov 48  }
 0x251   : > { %1800 = vrot.lane.b32.xlu1 %v3942_v43, %s3701_s30  ;;  %1802 = vrot.lane.b32.xlu0 %v3942_v43, %s3704_s6  ;;  %s3710_s30 = smov 40   ;;  %s3713_s6 = smov 16  }
 0x255   : > { %1972 = vrot.lane.b32.xlu1 %v3942_v43, %s3706_s17  ;;  %1974 = vrot.lane.b32.xlu0 %v3942_v43, %s3703_s16  ;;  %s3712_s16 = smov 8  }
 0x259   : > { %2144 = vrot.lane.b32.xlu1 %v3942_v43, %s3707_s19  ;;  %2146 = vrot.lane.b32.xlu0 %v3942_v43, %s3705_s3  ;;  %s3714_s3 = smov 24   ;;  %s4262_s19 = scalar_lea.vmem %s4221_s7, %s3836_s23 }
 0x25d   : > { %1201 = vrot.lane.b32.xlu1 %v3934_v42, %s3708_s25  ;;  %1033 = vrot.lane.b32.xlu0 %v3934_v42, %s3709_s24 }
 0x2b3   : > { %v1111_v44 = vpop.permute.xlu1 %1110  ;;  %v940_v45 = vpop.permute.xlu0 %939 }
 0x2b4   : > { %3347 = vmatpush3.xpose.msk.msra.mxu1 %vm941_vm3, %v940_v45 }
 0x2b5   : > { %3351 = vmatprep.subr.mxu1 %v3699_v38 }
 0x2b7   : > { %v1286_v46 = vpop.permute.xlu1 %1285  ;;  %3349 = vmatmul.mubr.msk.f32.vlgmr.msra.gmra.mrb[2].mxu1 %vm941_vm3, %v3934_v42  ;;  %v1113_v47 = vpop.permute.xlu0 %1112 }
 0x2b8   : > { %3357 = vmatpush3.xpose.msk.msra.mxu0 %vm941_vm3, %v1113_v47  ;;  %3353 = vmatprep.mubr.msk.f32.mxu1 %vm3700_vm2, %v3699_v38 }
 0x2b9   : > { %3366 = vmatprep.subr.mxu0 %v3699_v38 }
 0x2bb   : > { %v1459_v48 = vpop.permute.xlu1 %1458  ;;  %3359 = vmatmul.mubr.msk.f32.vlgmr.msra.gmra.mrb[0].mxu0 %vm941_vm3, %v1111_v44  ;;  %v1284_v49 = vpop.permute.xlu0 %1283 }
 0x2bc   : > { %3367 = vmatpush3.xpose.msk.msra.mxu0 %vm941_vm3, %v1286_v46  ;;  %3368 = vmatprep.mubr.msk.f32.mxu0 %vm3700_vm2, %v3699_v38 }
 0x2bd   : > { %3376 = vmatprep.subr.mxu0 %v3699_v38 }
 0x2bf   : > { %3369 = vmatmul.mubr.msk.f32.vlgmr.msra.gmra.mrb[2].mxu0 %vm941_vm3, %v1284_v49  ;;  %v1457_v50 = vpop.permute.xlu0 %1456  ;;  %v1631_v51 = vpop.permute.xlu1 %1630 }
 0x2c0   : > { %3377 = vmatpush3.xpose.msk.msra.mxu0 %vm941_vm3, %v1459_v48  ;;  %3378 = vmatprep.mubr.msk.f32.mxu0 %vm3700_vm2, %v3699_v38 }
 0x2c1   : > { %3386 = vmatprep.subr.mxu0 %v3699_v38 }
 0x2c3   : > { %3379 = vmatmul.mubr.msk.f32.vlgmr.msra.gmra.mrb[4].mxu0 %vm941_vm3, %v1457_v50  ;;  %v1803_v52 = vpop.permute.xlu0 %1802  ;;  %v1801_v53 = vpop.permute.xlu1 %1800 }
 0x2c4   : > { %3387 = vmatpush3.xpose.msk.msra.mxu0 %vm941_vm3, %v1631_v51  ;;  %3388 = vmatprep.mubr.msk.f32.mxu0 %vm3700_vm2, %v3699_v38 }
 0x2c5   : > { %3396 = vmatprep.subr.mxu0 %v3699_v38 }
 0x2c7   : > { %3389 = vmatmul.mubr.msk.f32.vlgmr.msra.gmra.mrb[6].mxu0 %vm941_vm3, %v3942_v43  ;;  %v1975_v54 = vpop.permute.xlu0 %1974  ;;  %v1973_v56 = vpop.permute.xlu1 %1972 }
 0x2c8   : > { %3397 = vmatpush3.xpose.msk.msra.mxu0 %vm941_vm3, %v1803_v52  ;;  %3398 = vmatprep.mubr.msk.f32.mxu0 %vm3700_vm2, %v3699_v38 }
 0x2c9   : > { %3406 = vmatprep.subr.mxu0 %v3699_v38 }
 0x2cb   : > { %3399 = vmatmul.mubr.msk.f32.vlgmr.msra.gmra.mrb[8].mxu0 %vm941_vm3, %v1801_v53  ;;  %v2147_v55 = vpop.permute.xlu0 %2146  ;;  %v2145_v58 = vpop.permute.xlu1 %2144 }
 0x2cc   : > { %3407 = vmatpush3.xpose.msk.msra.mxu0 %vm941_vm3, %v1975_v54  ;;  %3408 = vmatprep.mubr.msk.f32.mxu0 %vm3700_vm2, %v3699_v38 }
 0x2cd   : > { %3416 = vmatprep.subr.mxu0 %v3699_v38 }
 0x2cf   : > { %3409 = vmatmul.mubr.msk.f32.vlgmr.msra.gmra.mrb[10].mxu0 %vm941_vm3, %v1973_v56  ;;  %v1034_v57 = vpop.permute.xlu0 %1033  ;;  %v4011_v47 = vpop.permute.xlu1 %1201 }
 0x2d0   : > { %3352 = vmatpush3.msra.mxu1 %v1034_v57  ;;  %3417 = vmatpush3.xpose.msk.msra.mxu0 %vm941_vm3, %v2147_v55 }
 0x2d1   : > { %3418 = vmatprep.mubr.msk.f32.mxu0 %vm3700_vm2, %v3699_v38  ;;  %3361 = vmatprep.subr.mxu1 %v3699_v38 }
 0x2d3   : > { %3419 = vmatmul.mubr.msk.f32.vlgmr.msra.gmra.mrb[12].mxu0 %vm941_vm3, %v2145_v58 }
 0x38a   : > { %v1012_v0 = vpop.f32.mrb[2].mxu1 }
 0x38b   : > { %v1016_v1 = vmul.f32 0.35355338, %v1012_v0  ;;  %v3350_v2 = vpop.f32.mrb[3].mxu1 }
 0x38d   : > { %v1021_v3 = vadd.f32 %v1020_v63, %v1016_v1 }
 0x38e   : > { %v1184_v4 = vpop.f32.mrb[0].mxu0 }
 0x38f   : > { %v1188_v5 = vmul.f32 0.35355338, %v1184_v4  ;;  %v3360_v6 = vpop.f32.mrb[1].mxu0  ;;  %v1022_v7 = vsel %vm941_vm3, %v1021_v3, -inf }
 0x390   : > { %1023 = vmax.xlane.f32.xlu0 %v1022_v7 }
 0x391   : > { %v1189_v8 = vadd.f32 %v1188_v5, %v1020_v63 }
 0x392   : > { %v1357_v9 = vpop.f32.mrb[2].mxu0 }
 0x393   : > { %v1361_v10 = vmul.f32 0.35355338, %v1357_v9  ;;  %v3370_v11 = vpop.f32.mrb[3].mxu0  ;;  %v1190_v12 = vsel %vm941_vm3, %v1189_v8, -inf }
 0x394   : > { %1191 = vmax.xlane.f32.xlu1 %v1190_v12 }
 0x395   : > { %v1362_v13 = vadd.f32 %v1361_v10, %v1020_v63 }
 0x396   : > { %v1530_v15 = vpop.f32.mrb[4].mxu0 }
 0x397   : > { %v1534_v16 = vmul.f32 0.35355338, %v1530_v15  ;;  %v3380_v17 = vpop.f32.mrb[5].mxu0  ;;  %v1363_v18 = vsel %vm941_vm3, %v1362_v13, -inf }
 0x398   : > { %1364 = vmax.xlane.f32.xlu0 %v1363_v18 }
 0x399   : > { %v1535_v19 = vadd.f32 %v1534_v16, %v1020_v63 }
 0x39a   : > { %v1702_v21 = vpop.f32.mrb[6].mxu0 }
 0x39b   : > { %v1706_v22 = vmul.f32 0.35355338, %v1702_v21  ;;  %v3390_v23 = vpop.f32.mrb[7].mxu0  ;;  %v1536_v24 = vsel %vm941_vm3, %v1535_v19, -inf }
 0x39c   : > { %1537 = vmax.xlane.f32.xlu0 %v1536_v24 }
 0x39d   : > { %v1711_v25 = vadd.f32 %v1710_v20, %v1706_v22 }
 0x39e   : > { %v1874_v26 = vpop.f32.mrb[8].mxu0 }
 0x39f   : > { %v1878_v27 = vmul.f32 0.35355338, %v1874_v26  ;;  %v3400_v28 = vpop.f32.mrb[9].mxu0  ;;  %v1712_v29 = vsel %vm941_vm3, %v1711_v25, -inf }
 0x3a0   : > { %1713 = vmax.xlane.f32.xlu1 %v1712_v29 }
 0x3a1   : > { %v1879_v30 = vadd.f32 %v1878_v27, %v1710_v20 }
 0x3a2   : > { %v2046_v31 = vpop.f32.mrb[10].mxu0 }
 0x3a3   : > { %v2050_v32 = vmul.f32 0.35355338, %v2046_v31  ;;  %v3410_v33 = vpop.f32.mrb[11].mxu0  ;;  %v1880_v34 = vsel %vm941_vm3, %v1879_v30, -inf }
 0x3a4   : > { %1881 = vmax.xlane.f32.xlu0 %v1880_v34 }
 0x3a5   : > { %v2051_v36 = vadd.f32 %v2050_v32, %v1710_v20 }
 0x3a6   : > { %v2218_v39 = vpop.f32.mrb[12].mxu0 }
 0x3a7   : > { %v2222_v40 = vmul.f32 0.35355338, %v2218_v39  ;;  %v3420_v41 = vpop.f32.mrb[13].mxu0  ;;  %v2052_v44 = vsel %vm941_vm3, %v2051_v36, -inf }
 0x3a8   : > { %2053 = vmax.xlane.f32.xlu1 %v2052_v44 }
 0x3a9   : > { %v2223_v45 = vadd.f32 %v2222_v40, %v1710_v20 }
 0x3ab   : > { %v2224_v46 = vsel %vm941_vm3, %v2223_v45, -inf }
 0x3ac   : > { %2225 = vmax.xlane.f32.xlu0 %v2224_v46 }
 0x3b9   : > { %1547 = vrot.lane.b32.xlu1 %v3934_v42, %s3710_s30 }
 0x3c2   : > { %1374 = vrot.lane.b32.xlu0 %v3934_v42, %s3711_s1 }
 0x41d   : > { %v1024_v48 = vpop.xlane.xlu0 %1023 }
 0x41e   : > { %v1025_v49 = vsub.f32 %v1021_v3, %v1024_v48 }
 0x420   : > { %v1026_v50 = vmul.f32 1.442695, %v1025_v49 }
 0x421   : > { %v1192_v51 = vpop.xlane.xlu1 %1191 }
 0x422   : > { %3613 = vpow2.f32 %v1026_v50  ;;  %v1193_v52 = vsub.f32 %v1189_v8, %v1192_v51 }
 0x424   : > { %v1194_v53 = vmul.f32 1.442695, %v1193_v52 }
 0x425   : > { %v1365_v54 = vpop.xlane.xlu0 %1364 }
 0x426   : > { %3615 = vpow2.f32 %v1194_v53  ;;  %v1366_v55 = vsub.f32 %v1362_v13, %v1365_v54 }
 0x428   : > { %v1367_v56 = vmul.f32 1.442695, %v1366_v55 }
 0x429   : > { %v1538_v57 = vpop.xlane.xlu0 %1537 }
 0x42a   : > { %3617 = vpow2.f32 %v1367_v56  ;;  %v1539_v58 = vsub.f32 %v1535_v19, %v1538_v57 }
 0x42c   : > { %v3614_v59 = vpop.eup %3613  ;;  %v1540_v60 = vmul.f32 1.442695, %v1539_v58 }
 0x42d   : > { %v1028_v42 = vsel %vm941_vm3, %v3614_v59, 0.0  ;;  %v1714_v3 = vpop.xlane.xlu1 %1713 }
 0x42e   : > { %3619 = vpow2.f32 %v1540_v60  ;;  %1029 = vadd.xlane.f32.xlu1 %v1028_v42  ;;  %v1715_v4 = vsub.f32 %v1711_v25, %v1714_v3 }
 0x430   : > { %v3616_v61 = vpop.eup %3615  ;;  %v1716_v8 = vmul.f32 1.442695, %v1715_v4  ;;  %v2320_v4 = vld [vmem:[%s3851_s0 + $0x10] sm:$0xff] }
 0x431   : > { %v1196_v62 = vsel %vm941_vm3, %v3616_v61, 0.0  ;;  %v1882_v5 = vpop.xlane.xlu0 %1881 }
 0x432   : > { %1197 = vadd.xlane.f32.xlu0 %v1196_v62  ;;  %v1883_v7 = vsub.f32 %v1879_v30, %v1882_v5  ;;  %3621 = vpow2.f32 %v1716_v8  ;;  %v2321_v5 = vld [vmem:[%s3851_s0 + $0x18] sm:$0xff] }
 0x434   : > { %v3618_v63 = vpop.eup %3617  ;;  %v1884_v11 = vmul.f32 1.442695, %v1883_v7 }
 0x435   : > { %v1369_v0 = vsel %vm941_vm3, %v3618_v63, 0.0  ;;  %v2054_v6 = vpop.xlane.xlu1 %2053 }
 0x436   : > { %1370 = vadd.xlane.f32.xlu1 %v1369_v0  ;;  %v2055_v9 = vsub.f32 %v2051_v36, %v2054_v6  ;;  %3623 = vpow2.f32 %v1884_v11  ;;  %v2319_v0 = vld [vmem:[%s3851_s0 + $0x8] sm:$0xff]  ;;  %v3523_v6 = vpack.c.bf16 %v2321_v5, %v2320_v4  ;;  %v2571_v4 = vld [vmem:[%s3878_s20 + $0x20] sm:$0xff] }
 0x437   : > { %v2572_v5 = vld [vmem:[%s3878_s20 + $0x28] sm:$0xff] }
 0x438   : > { %v4016_v1 = vpop.eup %3619  ;;  %v2056_v12 = vmul.f32 1.442695, %v2055_v9 }
 0x439   : > { %v1542_v2 = vsel %vm941_vm3, %v4016_v1, 0.0  ;;  %v2226_v10 = vpop.xlane.xlu0 %2225  ;;  %v1548_v23 = vpop.permute.xlu1 %1547 }
 0x43a   : > { %1543 = vadd.xlane.f32.xlu0 %v1542_v2  ;;  %v2227_v13 = vsub.f32 %v2223_v45, %v2226_v10  ;;  %3625 = vpow2.f32 %v2056_v12 }
 0x43c   : > { %v2228_v14 = vmul.f32 1.442695, %v2227_v13  ;;  %v3622_v15 = vpop.eup %3621 }
 0x43d   : > { %v1718_v17 = vsel %vm941_vm3, %v3622_v15, 0.0  ;;  %v1375_v24 = vpop.permute.xlu0 %1374 }
 0x43e   : > { %3627 = vpow2.f32 %v2228_v14 }
 0x440   : > { %v4024_v16 = vpop.eup %3623 }
 0x441   : > { %v1886_v20 = vsel %vm941_vm3, %v4024_v16, 0.0 }
 0x444   : > { %v4027_v18 = vpop.eup %3625 }
 0x445   : > { %v2058_v19 = vsel %vm941_vm3, %v4027_v18, 0.0 }
 0x447   : > { %1891 = vrot.lane.b32.xlu1 %v3942_v43, %s3708_s25  ;;  %s4266_s25 = sld [smem:[#allocation14_spill]] (!%p3242_p5) }
 0x448   : > { %v4033_v21 = vpop.eup %3627 }
 0x449   : > { %v2230_v22 = vsel %vm941_vm3, %v4033_v21, 0.0 }
 0x450   : > { %1723 = vrot.lane.b32.xlu0 %v3942_v43, %s3709_s24  ;;  %s4269_s24 = sld [smem:[#allocation15_spill]] (!%p3242_p5) }
 0x46b   : > { %1719 = vadd.xlane.f32.xlu1 %v1718_v17 }
 0x46f   : > { %2059 = vadd.xlane.f32.xlu1 %v2058_v19  ;;  %1887 = vadd.xlane.f32.xlu0 %v1886_v20 }
 0x473   : > { %2231 = vadd.xlane.f32.xlu1 %v2230_v22 }
 0x484   : > { %2235 = vrot.lane.b32.xlu1 %v3942_v43, %s3710_s30 }
 0x485   : > { %2063 = vrot.lane.b32.xlu0 %v3942_v43, %s3711_s1  ;;  %s4267_s1 = sld [smem:[#allocation16_spill]] (!%p3242_p5) }
 0x4bb   : > { %v1030_v25 = vpop.xlane.xlu1 %1029 }
 0x4bc   : > { %3629 = vrcp.f32 %v1030_v25 }
 0x4bf   : > { %v1198_v26 = vpop.xlane.xlu0 %1197 }
 0x4c0   : > { %3631 = vrcp.f32 %v1198_v26 }
 0x4c3   : > { %v1371_v27 = vpop.xlane.xlu1 %1370 }
 0x4c4   : > { %3633 = vrcp.f32 %v1371_v27 }
 0x4c6   : > { %v3630_v28 = vpop.eup %3629 }
 0x4c7   : > { %v1032_v29 = vmul.f32 %v3630_v28, %v3614_v59  ;;  %v1544_v30 = vpop.xlane.xlu0 %1543  ;;  %v1892_v40 = vpop.permute.xlu1 %1891 }
 0x4c8   : > { %3635 = vrcp.f32 %v1544_v30 }
 0x4c9   : > { %3354 = vmatmul.mubr.msk.f32.vlgmr.msra.gmra.mrb[4].mxu1 %vm941_vm3, %v1032_v29 }
 0x4ca   : > { %v3632_v31 = vpop.eup %3631  ;;  %3362 = vmatpush3.msra.mxu1 %v4011_v47  ;;  %3363 = vmatprep.mubr.msk.f32.mxu1 %vm3700_vm2, %v3699_v38 }
 0x4cb   : > { %v1200_v43 = vmul.f32 %v3632_v31, %v3616_v61  ;;  %3371 = vmatprep.subr.mxu1 %v3699_v38  ;;  %v1724_v39 = vpop.permute.xlu0 %1723 }
 0x4cd   : > { %3364 = vmatmul.mubr.msk.f32.vlgmr.msra.gmra.mrb[6].mxu1 %vm941_vm3, %v1200_v43 }
 0x4ce   : > { %v3634_v32 = vpop.eup %3633  ;;  %3372 = vmatpush3.msra.mxu1 %v1375_v24  ;;  %3373 = vmatprep.mubr.msk.f32.mxu1 %vm3700_vm2, %v3699_v38 }
 0x4cf   : > { %v1373_v33 = vmul.f32 %v3634_v32, %v3618_v63  ;;  %3381 = vmatprep.subr.mxu1 %v3699_v38  ;;  %v2318_v63 = vld [vmem:[%s3851_s0] sm:$0xff] }
 0x4d0   : > { %v3519_v2 = vpack.c.bf16 %v2319_v0, %v2318_v63  ;;  %v2568_v63 = vld [vmem:[%s3878_s20 + $0x8] sm:$0xff] }
 0x4d1   : > { %3374 = vmatmul.mubr.msk.f32.vlgmr.msra.gmra.mrb[8].mxu1 %vm941_vm3, %v1373_v33 }
 0x4d2   : > { %v3636_v34 = vpop.eup %3635  ;;  %3382 = vmatpush3.msra.mxu1 %v1548_v23  ;;  %3383 = vmatprep.mubr.msk.f32.mxu1 %vm3700_vm2, %v3699_v38 }
 0x4d3   : > { %v1546_v36 = vmul.f32 %v3636_v34, %v4016_v1  ;;  %3391 = vmatprep.subr.mxu1 %v3699_v38  ;;  %3520 = vmatprep.subr.bf16.mxu0 %v3519_v2 }
 0x4d4   : > { %3522 = vmatpush3.bf16.msra.mxu0 %v3519_v2  ;;  %v2570_v2 = vld [vmem:[%s3878_s20 + $0x18] sm:$0xff] }
 0x4d5   : > { %3384 = vmatmul.mubr.msk.f32.vlgmr.msra.gmra.mrb[10].mxu1 %vm941_vm3, %v1546_v36  ;;  %3524 = vmatprep.subr.bf16.mxu0 %v3523_v6 }
 0x4d6   : > { %3392 = vmatpush3.msra.mxu1 %v1724_v39  ;;  %3393 = vmatprep.mubr.msk.f32.mxu1 %vm3700_vm2, %v3699_v38 }
 0x4d7   : > { %3401 = vmatprep.subr.mxu1 %v3699_v38 }
 0x4d8   : > { %3526 = vmatpush3.bf16.msra.mxu0 %v3523_v6  ;;  %v3543_v6 = vpack.c.bf16 %v2572_v5, %v2571_v4  ;;  %v2716_v4 = vld [vmem:[%s4266_s25] sm:$0xff] (!%p3242_p5)  ;;  %v2717_v5 = vld [vmem:[%s4266_s25 + $0x8] sm:$0xff] (!%p3242_p5) }
 0x4f8   : > { %v1720_v41 = vpop.xlane.xlu1 %1719 }
 0x4f9   : > { %3637 = vrcp.f32 %v1720_v41  ;;  %v2458_v41 = vld [vmem:[%s3868_s28 + $0x8] sm:$0xff] }
 0x4fc   : > { %v2060_v44 = vpop.xlane.xlu1 %2059  ;;  %v1888_v45 = vpop.xlane.xlu0 %1887 }
 0x4fd   : > { %3639 = vrcp.f32 %v1888_v45  ;;  %v2459_v45 = vld [vmem:[%s3868_s28 + $0x10] sm:$0xff] }
 0x4fe   : > { %3641 = vrcp.f32 %v2060_v44 }
 0x500   : > { %v2232_v46 = vpop.xlane.xlu1 %2231  ;;  %v2064_v52 = vpop.permute.xlu0 %2063 }
 0x501   : > { %3643 = vrcp.f32 %v2232_v46  ;;  %v2460_v46 = vld [vmem:[%s3868_s28 + $0x18] sm:$0xff] }
 0x503   : > { %v3638_v47 = vpop.eup %3637 }
 0x504   : > { %v1722_v48 = vmul.f32 %v3638_v47, %v3622_v15  ;;  %v2236_v55 = vpop.permute.xlu1 %2235  ;;  %v3531_v47 = vpack.c.bf16 %v2460_v46, %v2459_v45 }
 0x506   : > { %3394 = vmatmul.mubr.msk.f32.vlgmr.msra.gmra.mrb[12].mxu1 %vm941_vm3, %v1722_v48 }
 0x507   : > { %3402 = vmatpush3.msra.mxu1 %v1892_v40  ;;  %3403 = vmatprep.mubr.msk.f32.mxu1 %vm3700_vm2, %v3699_v38  ;;  %v3640_v49 = vpop.eup %3639  ;;  %v2457_v40 = vld [vmem:[%s3868_s28] sm:$0xff] }
 0x508   : > { %3411 = vmatprep.subr.mxu1 %v3699_v38  ;;  %v1890_v50 = vmul.f32 %v3640_v49, %v4024_v16  ;;  %v3642_v51 = vpop.eup %3641  ;;  %v3527_v44 = vpack.c.bf16 %v2458_v41, %v2457_v40 }
 0x509   : > { %v2062_v53 = vmul.f32 %v3642_v51, %v4027_v18 }
 0x50a   : > { %3404 = vmatmul.mubr.msk.f32.vlgmr.msra.gmra.mrb[14].mxu1 %vm941_vm3, %v1890_v50 }
 0x50b   : > { %3412 = vmatpush3.msra.mxu1 %v2064_v52  ;;  %3413 = vmatprep.mubr.msk.f32.mxu1 %vm3700_vm2, %v3699_v38  ;;  %v3644_v54 = vpop.eup %3643 }
 0x50c   : > { %3421 = vmatprep.subr.mxu1 %v3699_v38  ;;  %v2234_v56 = vmul.f32 %v3644_v54, %v4033_v21  ;;  %v3229_v21 = vld [vmem:[%s4262_s19] ss:$0 sm:$0xff] }
 0x50e   : > { %3414 = vmatmul.mubr.msk.f32.vlgmr.msra.gmra.mrb[16].mxu1 %vm941_vm3, %v2062_v53 }
 0x50f   : > { %3422 = vmatpush3.msra.mxu1 %v2236_v55  ;;  %3423 = vmatprep.mubr.msk.f32.mxu1 %vm3700_vm2, %v3699_v38  ;;  %v3232_v55 = vld [vmem:[%s4263_s4] ss:$0 sm:$0xff] }
 0x510   : > { %3528 = vmatprep.subr.bf16.mxu1 %v3527_v44 }
 0x512   : > { %3424 = vmatmul.mubr.msk.f32.vlgmr.msra.gmra.mrb[18].mxu1 %vm941_vm3, %v2234_v56 }
 0x513   : > { %3530 = vmatpush3.bf16.msra.mxu1 %v3527_v44 }
 0x514   : > { %3532 = vmatprep.subr.bf16.mxu1 %v3531_v47 }
 0x517   : > { %3534 = vmatpush3.bf16.msra.mxu1 %v3531_v47 }
 0x59c   : > { %v1105_v57 = vpop.f32.mrb[4].mxu1 }
 0x59d   : > { %1109 = vst.msk [vmem:[#allocation3] sm:$0xff] %vm941_vm3, %v1105_v57  ;;  %v3355_v58 = vpop.f32.mrb[5].mxu1  ;;  %v3233_v57 = vld [vmem:[%s4264_s29] ss:$0 sm:$0xff] }
 0x5a0   : > { %v1273_v59 = vpop.f32.mrb[6].mxu1 }
 0x5a1   : > { %1278 = vrot.lane.b32.xlu0 %v1273_v59, %s3712_s16  ;;  %v3365_v60 = vpop.f32.mrb[7].mxu1 }
 0x5a4   : > { %v1446_v42 = vpop.f32.mrb[8].mxu1 }
 0x5a5   : > { %1451 = vrot.lane.b32.xlu1 %v1446_v42, %s3713_s6  ;;  %v3375_v38 = vpop.f32.mrb[9].mxu1 }
 0x5a8   : > { %v1619_v61 = vpop.f32.mrb[10].mxu1 }
 0x5a9   : > { %1624 = vrot.lane.b32.xlu1 %v1619_v61, %s3714_s3  ;;  %v3385_v62 = vpop.f32.mrb[11].mxu1 }
 0x5aa   : > { %v2567_v62 = vld [vmem:[%s3878_s20] sm:$0xff] }
 0x5ab   : > { %v3535_v0 = vpack.c.bf16 %v2568_v63, %v2567_v62  ;;  %v3241_v62 = vld [vmem:[%s787_s18] ss:$0 sm:$0xff] }
 0x5ad   : > { %3536 = vmatprep.subr.bf16.mxu0 %v3535_v0 }
 0x5d9   : > { %v1795_v1 = vpop.f32.mrb[12].mxu1 }
 0x5da   : > { %1799 = vst.msk [vmem:[#allocation3 + $0x8] sm:$0xff] %vm941_vm3, %v1795_v1  ;;  %v3395_v3 = vpop.f32.mrb[13].mxu1  ;;  %v2569_v1 = vld [vmem:[%s3878_s20 + $0x10] sm:$0xff] }
 0x5db   : > { %v3539_v3 = vpack.c.bf16 %v2570_v2, %v2569_v1 }
 0x5dd   : > { %v1963_v7 = vpop.f32.mrb[14].mxu1 }
 0x5de   : > { %1968 = vrot.lane.b32.xlu0 %v1963_v7, %s3712_s16  ;;  %v3405_v8 = vpop.f32.mrb[15].mxu1  ;;  %v2573_v7 = vld [vmem:[%s3878_s20 + $0x30] sm:$0xff]  ;;  %s4265_s16 = scalar_lea.vmem %s4225_s11, %s3836_s23 }
 0x5df   : > { %v2574_v8 = vld [vmem:[%s3878_s20 + $0x38] sm:$0xff] }
 0x5e1   : > { %v2135_v9 = vpop.f32.mrb[16].mxu1 }
 0x5e2   : > { %2140 = vrot.lane.b32.xlu0 %v2135_v9, %s3713_s6  ;;  %v3415_v10 = vpop.f32.mrb[17].mxu1  ;;  %v3547_v9 = vpack.c.bf16 %v2574_v8, %v2573_v7  ;;  %v3715_v7 = vmov (!%p3242_p5), 0.0|0.0   ;;  %v3552_v8 = vpack.c.bf16 (!%p3242_p5), %v2717_v5, %v2716_v4 }
 0x5e3   : > { %v3234_v10 = vld [vmem:[%s4265_s16] ss:$0 sm:$0xff]  ;;  %3557 = vmatprep.subr.bf16.mxu1 (!%p3242_p5), %v3715_v7  ;;  %s4268_s16 = smov (!%p3242_p5), %s4267_s1 }
 0x5e5   : > { %v2307_v11 = vpop.f32.mrb[18].mxu1 }
 0x5e6   : > { %2312 = vrot.lane.b32.xlu1 %v2307_v11, %s3714_s3  ;;  %v3425_v12 = vpop.f32.mrb[19].mxu1 }
 0x613   : > { %v1279_v13 = vpop.permute.xlu0 %1278 }
 0x614   : > { %1282 = vst.msk [vmem:[#allocation3] sm:$0xff] %vm1281_vm4, %v1279_v13 }
 0x617   : > { %v1452_v14 = vpop.permute.xlu1 %1451 }
 0x618   : > { %1455 = vst.msk [vmem:[#allocation3] sm:$0xff] %vm1454_vm5, %v1452_v14 }
 0x61b   : > { %v1625_v15 = vpop.permute.xlu1 %1624 }
 0x61c   : > { %1628 = vst.msk [vmem:[#allocation3] sm:$0xff] %vm1627_vm6, %v1625_v15 }
 0x623   : > { %v2316_v16 = vld [vmem:[#allocation3] sm:$0xff] }
 0x624   : > { %3434 = vmatprep.mubr.msk.f32.mxu0 %vm855_vm1, %v2316_v16 }
 0x650   : > { %v1969_v17 = vpop.permute.xlu0 %1968 }
 0x651   : > { %1971 = vst.msk [vmem:[#allocation3 + $0x8] sm:$0xff] %vm1281_vm4, %v1969_v17 }
 0x654   : > { %v2141_v18 = vpop.permute.xlu0 %2140 }
 0x655   : > { %2143 = vst.msk [vmem:[#allocation3 + $0x8] sm:$0xff] %vm1454_vm5, %v2141_v18 }
 0x658   : > { %v2313_v19 = vpop.permute.xlu1 %2312 }
 0x659   : > { %2315 = vst.msk [vmem:[#allocation3 + $0x8] sm:$0xff] %vm1627_vm6, %v2313_v19 }
 0x660   : > { %v2317_v20 = vld [vmem:[#allocation3 + $0x8] sm:$0xff] }
 0x661   : > { %3435 = vmatmul.mubr.msk.f32.vlgmr.msra.gmra.mrb[14].mxu0 %vm855_vm1, %v2317_v20 }
 0x662   : > { %3538 = vmatpush3.bf16.msra.mxu0 %v3535_v0 }
 0x663   : > { %3540 = vmatprep.subr.bf16.mxu0 %v3539_v3 }
 0x666   : > { %3542 = vmatpush3.bf16.msra.mxu0 %v3539_v3 }
 0x667   : > { %3544 = vmatprep.subr.bf16.mxu0 %v3543_v6 }
 0x66a   : > { %3546 = vmatpush3.bf16.msra.mxu0 %v3543_v6  ;;  %v2718_v6 = vld [vmem:[%s4266_s25 + $0x10] sm:$0xff] (!%p3242_p5) }
 0x66b   : > { %3548 = vmatprep.subr.bf16.mxu0 %v3547_v9 }
 0x66e   : > { %3550 = vmatpush3.bf16.msra.mxu0 %v3547_v9  ;;  %v2719_v9 = vld [vmem:[%s4266_s25 + $0x18] sm:$0xff] (!%p3242_p5) }
 0x66f   : > { %3551 = vmatprep.subr.bf16.mxu0 (!%p3242_p5), %v3715_v7 }
 0x734   : > { %v3436_v22 = vpop.f32.mrb[14].mxu0 }
 0x735   : > { %v2407_v23 = vadd.f32 %v3436_v22, %v3229_v21  ;;  %v2401_v24 = vpop.f32.mrb[15].mxu0 }
 0x736   : > { %v2402_v25 = vadd.f32 %v3229_v21, %v2401_v24 }
 0x737   : > { %v2411_v26 = vadd.f32 %v2407_v23, %v3919_v37 }
 0x738   : > { %v2410_v27 = vadd.f32 %v2402_v25, %v3915_v35 }
 0x739   : > { %v2417_v28 = vsel %vm855_vm1, %v2411_v26, 0.0 }
 0x73a   : > { %2418 = vadd.xlane.f32.xlu1 %v2417_v28  ;;  %v2414_v29 = vsel %vm855_vm1, %v2410_v27, 0.0 }
 0x73b   : > { %2415 = vadd.xlane.f32.xlu0 %v2414_v29 }
 0x7c7   : > { %v2419_v30 = vpop.xlane.xlu1 %2418 }
 0x7c8   : > { %v2422_v31 = vmul.f32 0.03125, %v2419_v30  ;;  %v2416_v43 = vpop.xlane.xlu0 %2415 }
 0x7c9   : > { %v2421_v32 = vmul.f32 0.03125, %v2416_v43 }
 0x7ca   : > { %v2424_v33 = vsub.f32 %v2411_v26, %v2422_v31 }
 0x7cb   : > { %v2423_v34 = vsub.f32 %v2410_v27, %v2421_v32  ;;  %v3237_v32 = vld [vmem:[%s781_s2] ss:$0 sm:$0xff] }
 0x7cc   : > { %v2426_v35 = vmul.f32 %v2424_v33, %v2424_v33 }
 0x7cd   : > { %v2425_v36 = vmul.f32 %v2423_v34, %v2423_v34 }
 0x7ce   : > { %v2430_v39 = vsel %vm855_vm1, %v2426_v35, 0.0 }
 0x7cf   : > { %v2427_v37 = vsel %vm855_vm1, %v2425_v36, 0.0 }
 0x7d0   : > { %2428 = vadd.xlane.f32.xlu0 %v2427_v37 }
 0x7d4   : > { %2431 = vadd.xlane.f32.xlu0 %v2430_v39 }
 0x85d   : > { %v2429_v48 = vpop.xlane.xlu0 %2428 }
 0x85e   : > { %v2433_v49 = vmul.f32 0.03125, %v2429_v48 }
 0x860   : > { %v2435_v50 = vadd.f32 1e-12, %v2433_v49 }
 0x861   : > { %v2432_v51 = vpop.xlane.xlu0 %2431 }
 0x862   : > { %3645 = vrsqrt.f32 %v2435_v50  ;;  %v2434_v52 = vmul.f32 0.03125, %v2432_v51 }
 0x864   : > { %v2436_v53 = vadd.f32 1e-12, %v2434_v52 }
 0x866   : > { %3647 = vrsqrt.f32 %v2436_v53 }
 0x86c   : > { %v3646_v54 = vpop.eup %3645 }
 0x86d   : > { %v2439_v56 = vmul.f32 %v3646_v54, %v2423_v34 }
 0x86f   : > { %v2447_v58 = vmul.f32 %v3232_v55, %v2439_v56 }
 0x870   : > { %v3648_v59 = vpop.eup %3647 }
 0x871   : > { %v2440_v60 = vmul.f32 %v3648_v59, %v2424_v33  ;;  %v2455_v42 = vadd.f32 %v3233_v57, %v2447_v58 }
 0x873   : > { %v2448_v38 = vmul.f32 %v3232_v55, %v2440_v60  ;;  %3445 = vmatprep.mubr.msk.f32.mxu1 %vm855_vm1, %v2455_v42 }
 0x875   : > { %v2456_v61 = vadd.f32 %v3233_v57, %v2448_v38 }
 0x877   : > { %3446 = vmatmul.mubr.msk.f32.vlgmr.msra.gmra.mrb[20].mxu1 %vm855_vm1, %v2456_v61 }
 0x94a   : > { %v3447_v11 = vpop.f32.mrb[20].mxu1 }
 0x94b   : > { %v2546_v12 = vadd.f32 %v3447_v11, %v3234_v10  ;;  %v2540_v13 = vpop.f32.mrb[21].mxu1  ;;  %v3555_v11 = vpack.c.bf16 (!%p3242_p5), %v2719_v9, %v2718_v6 }
 0x94c   : > { %v2541_v14 = vadd.f32 %v3234_v10, %v2540_v13  ;;  %v3717_v10 = vmov (!%p3242_p5), 0.0   ;;  %v2796_v13 = vld [vmem:[%s4268_s16 + $0x8] sm:$0xff] (!%p3242_p5) }
 0x94d   : > { %v2550_v15 = vmul.f32 %v2546_v12, %v2546_v12  ;;  %3486 = vmatprep.mubr.msk.f32.mxu1 (!%p3242_p5), %vm3716_vm8, %v3717_v10 }
 0x94e   : > { %v2549_v16 = vmul.f32 %v2541_v14, %v2541_v14 }
 0x94f   : > { %v2552_v17 = vmul.f32 %v2550_v15, %v2546_v12  ;;  %v2797_v15 = vld [vmem:[%s4268_s16 + $0x10] sm:$0xff] (!%p3242_p5) }
 0x950   : > { %v2551_v18 = vmul.f32 %v2549_v16, %v2541_v14  ;;  %v2798_v16 = vld [vmem:[%s4268_s16 + $0x18] sm:$0xff] (!%p3242_p5) }
 0x951   : > { %v2554_v19 = vmul.f32 0.044715, %v2552_v17  ;;  %v3561_v17 = vpack.c.bf16 (!%p3242_p5), %v2798_v16, %v2797_v15 }
 0x952   : > { %v2553_v20 = vmul.f32 0.044715, %v2551_v18  ;;  %v2720_v18 = vld [vmem:[%s4269_s24] sm:$0x1] (!%p3242_p5) }
 0x953   : > { %v2556_v21 = vadd.f32 %v2554_v19, %v2546_v12 }
 0x954   : > { %v2555_v22 = vadd.f32 %v2553_v20, %v2541_v14 }
 0x955   : > { %v2558_v23 = vmul.f32 0.7978846, %v2556_v21 }
 0x956   : > { %v2557_v24 = vmul.f32 0.7978846, %v2555_v22  ;;  %v2879_v22 = vld [vmem:[%s4269_s24] sm:$0x1] (!%p3242_p5) }
 0x957   : > { %3649 = vtanh.f32 %v2558_v23 }
 0x958   : > { %3651 = vtanh.f32 %v2557_v24 }
 0x961   : > { %v3650_v25 = vpop.eup %3649 }
 0x962   : > { %v3652_v26 = vpop.eup %3651  ;;  %v2562_v27 = vadd.f32 1.0, %v3650_v25 }
 0x963   : > { %v2561_v28 = vadd.f32 1.0, %v3652_v26 }
 0x964   : > { %v2564_v29 = vmul.f32 0.5, %v2562_v27 }
 0x965   : > { %v2563_v30 = vmul.f32 0.5, %v2561_v28  ;;  %v2799_v28 = vld [vmem:[%s4270_s27] sm:$0x1] (!%p3242_p5) }
 0x966   : > { %v2566_v43 = vmul.f32 %v2564_v29, %v2546_v12  ;;  %v2795_v12 = vld [vmem:[%s4267_s1] sm:$0xff] (!%p3242_p5) }
 0x967   : > { %v2565_v31 = vmul.f32 %v2563_v30, %v2541_v14  ;;  %v3558_v14 = vpack.c.bf16 (!%p3242_p5), %v2796_v13, %v2795_v12 }
 0x969   : > { %3464 = vmatprep.mubr.msk.f32.mxu0 %vm2582_vm7, %v2565_v31  ;;  %3559 = vmatpush3.bf16.msra.mxu1 (!%p3242_p5), %v3558_v14 }
 0x96a   : > { %3465 = vmatmul.mubr.msk.f32.vlgmr.msra.gmra.mrb[16].mxu0 %vm2582_vm7, %v2566_v43  ;;  %3560 = vmatprep.subr.bf16.mxu1 (!%p3242_p5), %v3715_v7  ;;  %v2958_v43 = vld [vmem:[%s4270_s27] sm:$0x1] (!%p3242_p5) }
 0x96b   : > { %3475 = vmatprep.mubr.msk.f32.mxu0 (!%p3242_p5), %vm3716_vm8, %v3717_v10  ;;  %3553 = vmatpush3.bf16.msra.mxu0 (!%p3242_p5), %v3552_v8 }
 0x96c   : > { %3554 = vmatprep.subr.bf16.mxu0 (!%p3242_p5), %v3715_v7 }
 0x96d   : > { %3562 = vmatpush3.bf16.msra.mxu1 (!%p3242_p5), %v3561_v17 }
 0x96e   : > { %3569 = vmatprep.subr.bf16.mxu1 (!%p3242_p5), %v3715_v7 }
 0x96f   : > { %3556 = vmatpush3.bf16.msra.mxu0 (!%p3242_p5), %v3555_v11 }
 0x970   : > { %3563 = vmatprep.subr.bf16.mxu0 (!%p3242_p5), %v3715_v7 }
 0xa3d   : > { %v3466_v33 = vpop.f32.mrb[16].mxu0 }
 0xa3e   : > { %v2661_v34 = vadd.f32 %v3466_v33, %v3237_v32  ;;  %v2655_v36 = vpop.f32.mrb[17].mxu0 }
 0xa3f   : > { %v2656_v37 = vadd.f32 %v3237_v32, %v2655_v36 }
 0xa40   : > { %v2665_v35 = vadd.f32 %v2661_v34, %v2456_v61 }
 0xa41   : > { %v2664_v39 = vadd.f32 %v2656_v37, %v2455_v42  ;;  %v3240_v42 = vld [vmem:[%s784_s26] ss:$0 sm:$0xff] }
 0xa42   : > { %v2671_v40 = vsel %vm855_vm1, %v2665_v35, 0.0 }
 0xa43   : > { %2672 = vadd.xlane.f32.xlu0 %v2671_v40  ;;  %v2668_v41 = vsel %vm855_vm1, %v2664_v39, 0.0 }
 0xa44   : > { %2669 = vadd.xlane.f32.xlu1 %v2668_v41 }
 0xad0   : > { %v2673_v44 = vpop.xlane.xlu0 %2672 }
 0xad1   : > { %v2675_v45 = vmul.f32 0.03125, %v2673_v44  ;;  %v2670_v46 = vpop.xlane.xlu1 %2669 }
 0xad2   : > { %v2674_v47 = vmul.f32 0.03125, %v2670_v46 }
 0xad3   : > { %v2677_v48 = vsub.f32 %v2665_v35, %v2675_v45 }
 0xad4   : > { %v2676_v49 = vsub.f32 %v2664_v39, %v2674_v47 }
 0xad5   : > { %v2679_v50 = vmul.f32 %v2677_v48, %v2677_v48 }
 0xad6   : > { %v2678_v51 = vmul.f32 %v2676_v49, %v2676_v49 }
 0xad7   : > { %v2683_v52 = vsel %vm855_vm1, %v2679_v50, 0.0 }
 0xad8   : > { %2684 = vadd.xlane.f32.xlu0 %v2683_v52  ;;  %v2680_v53 = vsel %vm855_vm1, %v2678_v51, 0.0 }
 0xad9   : > { %2681 = vadd.xlane.f32.xlu1 %v2680_v53 }
 0xb65   : > { %v2685_v54 = vpop.xlane.xlu0 %2684 }
 0xb66   : > { %v2687_v55 = vmul.f32 0.03125, %v2685_v54  ;;  %v2682_v56 = vpop.xlane.xlu1 %2681 }
 0xb67   : > { %v2686_v57 = vmul.f32 0.03125, %v2682_v56 }
 0xb68   : > { %v2689_v58 = vadd.f32 1e-12, %v2687_v55 }
 0xb69   : > { %v2688_v59 = vadd.f32 1e-12, %v2686_v57 }
 0xb6a   : > { %3653 = vrsqrt.f32 %v2689_v58 }
 0xb6b   : > { %3655 = vrsqrt.f32 %v2688_v59 }
 0xb74   : > { %v3654_v60 = vpop.eup %3653 }
 0xb75   : > { %v3656_v38 = vpop.eup %3655  ;;  %v2693_v61 = vmul.f32 %v3654_v60, %v2677_v48 }
 0xb76   : > { %v2692_v63 = vmul.f32 %v3656_v38, %v2676_v49  ;;  %2715 = sbr.rel (%p3242_p5) target bundleno = 3388 (0xd3c), region = 108 }
 0xb77   : > { %v2701_v0 = vmul.f32 %v3240_v42, %v2693_v61 }
 0xb78   : > { %v2700_v1 = vmul.f32 %v3240_v42, %v2692_v63 }
 0xb79   : > { %v2709_v2 = vadd.f32 %v3241_v62, %v2701_v0 }
 0xb7a   : > { %v2708_v3 = vadd.f32 %v3241_v62, %v2700_v1 }
 0xb7b   : > { %2711 = vst.msk [vmem:[#allocation2 + $0x8] sm:$0xff] %vm855_vm1, %v2709_v2 }
 0xb7c   : > { %2710 = vst.msk [vmem:[#allocation2] sm:$0xff] %vm855_vm1, %v2708_v3  ;;  %3476 = vmatmul.mubr.msk.f32.vlgmr.msra.gmra.mrb[0].mxu0 (!%p3242_p5), %vm855_vm1, %v2708_v3 }
 0xb7d   : > { %3565 = vmatpush3.bf16.msra.mxu0 %v3552_v8  ;;  %3497 = vmatprep.mubr.msk.f32.mxu0 %vm3716_vm8, %v3717_v10 }
 0xb7e   : > { %3566 = vmatprep.subr.bf16.mxu0 %v3715_v7 }
 0xb81   : > { %3568 = vmatpush3.bf16.msra.mxu0 %v3555_v11 }
 0xb84   : > { %3498 = vmatmul.mubr.msk.f32.vlgmr.msra.gmra.mrb[2].mxu0 %vm855_vm1, %v2709_v2 }
 0xc4f   : > { %v2790_v19 = vpop.f32.mrb[0].mxu0 }
 0xc50   : > { %v2791_v20 = vadd.f32 %v2790_v19, %v2720_v18  ;;  %v3477_v21 = vpop.f32.mrb[1].mxu0 }
 0xc52   : > { %3657 = vtanh.f32 %v2791_v20 }
 0xc57   : > { %v2949_v23 = vpop.f32.mrb[2].mxu0 }
 0xc58   : > { %v2950_v24 = vadd.f32 %v2949_v23, %v2879_v22  ;;  %v3499_v25 = vpop.f32.mrb[3].mxu0 }
 0xc5a   : > { %3659 = vtanh.f32 %v2950_v24 }
 0xc5c   : > { %v3658_v26 = vpop.eup %3657 }
 0xc5d   : > { %3487 = vmatmul.mubr.msk.f32.vlgmr.msra.gmra.mrb[0].mxu1 %vm855_vm1, %v3658_v26 }
 0xc5e   : > { %3571 = vmatpush3.bf16.msra.mxu1 %v3558_v14  ;;  %3508 = vmatprep.mubr.msk.f32.mxu1 %vm3716_vm8, %v3717_v10 }
 0xc5f   : > { %3572 = vmatprep.subr.bf16.mxu1 %v3715_v7 }
 0xc62   : > { %3574 = vmatpush3.bf16.msra.mxu1 %v3561_v17 }
 0xc64   : > { %v3660_v27 = vpop.eup %3659 }
 0xc65   : > { %3509 = vmatmul.mubr.msk.f32.vlgmr.msra.gmra.mrb[2].mxu1 %vm855_vm1, %v3660_v27 }
 0xd30   : > { %v2869_v29 = vpop.f32.mrb[0].mxu1 }
 0xd31   : > { %v2870_v30 = vadd.f32 %v2869_v29, %v2799_v28  ;;  %v3488_v31 = vpop.f32.mrb[1].mxu1 }
 0xd33   : > { %2874 = vst.msk [vmem:[#allocation4] sm:$0x1] %vm2873_vm9, %v2870_v30 }
 0xd38   : > { %v3028_v32 = vpop.f32.mrb[2].mxu1 }
 0xd39   : > { %v3029_v33 = vadd.f32 %v3028_v32, %v2958_v43  ;;  %v3510_v34 = vpop.f32.mrb[3].mxu1 }
 0xd3b   : > { %3032 = vst.msk [vmem:[#allocation4 + $0x1] sm:$0x1] %vm2873_vm9, %v3029_v33 }
 0xd3c PF: > { %p3579_p6 = scmp.eq.s32.totalorder %s3830_s22, 1  ;;  %s3718_s1 = smov [#allocation4]  }
 0xd3d   : > { %s3040_s20 = sshll.u32 %s3718_s1, 4  ;;  %s3041_s20 = int_to_ptr.vmem [resolvable:$true] %s3040_s20 }
 0xd3e   : > { %s3661_s6 = scalar_lea.vmem %s3041_s20, 32  ;;  %p3668_p10 = scmp.lt.s32.totalorder %s3041_s20, %s3041_s20 }
 0xd3f   : > { %p3662_p7 = scmp.ne.s32.totalorder %s3041_s20, %s3661_s6  ;;  %p3669_p11 = scmp.lt.s32.totalorder %s3661_s6, %s3661_s6 }
 0xd41   : > { %p3663_p8 = pnand %p3662_p7, %p3579_p6  ;;  %p3670_p12 = por %p3669_p11, %p3668_p10 }
 0xd43   : > { %p3664_p9 = pneg %p3663_p8 }
 0xd45   : > { %p3671_p13 = pnand %p3670_p12, %p3664_p9 }
 0xd47   : > { %3674 = shalt.err (!%p3671_p13)
}
 0xd48   : > { %s4271_s0 = sld [smem:[#allocation18_spill]] }
 0xd4e   : > { %s3675_s17 = scalar_lea.hbm %s4271_s0, 32 }
 0xd4f   : > { %p3676_p0 = scmp.ne.s32.totalorder %s4271_s0, %s3675_s17  ;;  %p3681_p3 = scmp.lt.u32.totalorder %s3675_s17, %s4271_s0 }
 0xd51   : > { %p3677_p1 = pnand %p3676_p0, %p3579_p6 }
 0xd53   : > { %p3678_p2 = pneg %p3677_p1 }
 0xd55   : > { %p3683_p4 = pnand %p3681_p3, %p3678_p2 }
 0xd57   : > { %3686 = shalt.err (!%p3683_p4)
}
 0xd58   : > { %3576 = dma.vmem_to_hbm [thread:$0]  (%p3579_p6), %s3041_s20, 32, %s4271_s0, [#allocation5]  }
 0xd59   : > { %3692 = dma.done.wait (%p3579_p6), [#allocation5], 32  }
 0xd5a   : > { %3694 = vsyncadd (%p3579_p6), [#allocation5], 4294967264 }
 0xd5b PF: > { %s4272_s29 = sld [smem:[#allocation7_spill]] }
 0xd61   : > { %s31_s1 = sadd.s32 1, %s4272_s29  }
 0xd62   : > { %p28_p5 = scmp.ge.s32.totalorder %s31_s1, 4  }
 0xd64   :  { %30 = sbr.rel (!%p28_p5) target bundleno = 13 (0xd), region = 168 }
 0xd6b   :  { %3053 = vsyncpa [#allocation5], 1 }
 0xd6c   :  { %3055 = vsyncpa [#allocation5 + $0x1], 1 }

</bundles_post_ra>
